<compile_context>
chip_gen: v6e
topology: v6e:2x2x1
jax: 0.10.0
libtpu: 0.0.40
codegen_flags: <defaults>
</compile_context>

<pallas_src>
import functools

import jax
import jax.numpy as jnp
from jax.experimental import pallas as pl
from jax.experimental.pallas import tpu as pltpu

LANE = 128                       # TPU lane width: keep channel dims lane-dense
ACT_DTYPE = jnp.bfloat16         # activations / MXU operands; stats stay f32
EPS = 1e-5                       # nn.InstanceNorm1d default eps
VMEM_LIMIT = 32 * 1024 * 1024    # explicit scoped-VMEM budget (fits v7x's 64 MiB)


def _round_up(n, m):
    return ((n + m - 1) // m) * m


def _pad_amounts(K):
    """pad_layer reflect amounts for kernel size K."""
    if K == 1:
        return 0, 0
    return (K // 2, K // 2) if K % 2 == 1 else (K // 2, K // 2 - 1)


# ------------------------- in-kernel helper functions -------------------------

def _reflect_into(pad_ref, x, pad_l, pad_r):
    """Write the reflect-padded (along time/sublane) copy of x into the f32 scratch."""
    T = x.shape[0]
    xf = x.astype(jnp.float32)
    pad_ref[pad_l:pad_l + T, :] = xf
    for i in range(pad_l):                       # left reflect rows: x[pad_l], ..., x[1]
        pad_ref[i:i + 1, :] = xf[pad_l - i:pad_l - i + 1, :]
    for j in range(pad_r):                       # right reflect rows: x[T-2], x[T-3], ...
        pad_ref[pad_l + T + j:pad_l + T + j + 1, :] = xf[T - 2 - j:T - 1 - j, :]


def _im2col(pad_ref, K, T):
    """(T, K*C) operand: K shifted views concatenated along lanes -> ONE MXU matmul."""
    if K == 1:
        return pad_ref[0:T, :]
    return jnp.concatenate([pad_ref[k:k + T, :] for k in range(K)], axis=-1)


def _instance_norm(h):
    mean = jnp.mean(h, axis=0, keepdims=True)
    d = h - mean
    var = jnp.mean(d * d, axis=0, keepdims=True)        # biased variance (PyTorch)
    return d * jax.lax.rsqrt(var + EPS)


def _leaky(h, neg_slope):
    return jnp.where(h >= 0.0, h, neg_slope * h)


def _tile_lanes(v, up):
    return v if up == 1 else jnp.concatenate([v] * up, axis=-1)


# ------------------------------- Pallas kernels -------------------------------

def _in_kernel(x_ref, w_ref, b_ref, o_ref, *, neg_slope):
    # 1x1 conv + InstanceNorm + activation, fused.  x_ref: (1, T, Cin_pad) bf16.
    h = jnp.dot(x_ref[0], w_ref[...], preferred_element_type=jnp.float32)
    h = h + b_ref[...]
    h = _leaky(_instance_norm(h), neg_slope)
    o_ref[0] = h.astype(o_ref.dtype)


def _block_kernel(x_ref, w1_ref, b1_ref, w2_ref, b2_ref, aff_ref, o_ref, pad_ref,
                  *, K, up, neg_slope):
    # Whole decoder conv block fused.  x_ref: (1, T, C) bf16, output (1, T, up*C).
    T = x_ref.shape[1]
    C = x_ref.shape[2]
    pad_l, pad_r = _pad_amounts(K)
    x = x_ref[0]                                                     # (T, C) bf16

    # ---- first conv: reflect pad (scratch) + im2col -> one MXU matmul ----
    _reflect_into(pad_ref, x, pad_l, pad_r)
    m1 = _im2col(pad_ref, K, T).astype(w1_ref.dtype)                 # (T, K*C) bf16
    h = jnp.dot(m1, w1_ref[...], preferred_element_type=jnp.float32) + b1_ref[...]

    # ---- InstanceNorm + AdaIN + activation (f32) ----
    mu1 = aff_ref[0, 0:1, :]
    sig1 = aff_ref[0, 1:2, :]
    h = _leaky(_instance_norm(h) * sig1 + mu1, neg_slope)            # (T, C) f32

    # ---- second conv: output columns pre-ordered as [phase r, channel c] ----
    _reflect_into(pad_ref, h, pad_l, pad_r)
    m2 = _im2col(pad_ref, K, T).astype(w2_ref.dtype)
    g = jnp.dot(m2, w2_ref[...], preferred_element_type=jnp.float32) + b2_ref[...]  # (T, up*C)

    # ---- InstanceNorm over (T x up phases) per channel == post-pixel-shuffle IN ----
    cmean = jnp.mean(g, axis=0, keepdims=True)                       # (1, up*C)
    mean_c = cmean[:, 0:C]
    for r in range(1, up):
        mean_c = mean_c + cmean[:, r * C:(r + 1) * C]
    mean_c = mean_c / up
    dg = g - _tile_lanes(mean_c, up)
    cvar = jnp.mean(dg * dg, axis=0, keepdims=True)
    var_c = cvar[:, 0:C]
    for r in range(1, up):
        var_c = var_c + cvar[:, r * C:(r + 1) * C]
    var_c = var_c / up
    g = dg * _tile_lanes(jax.lax.rsqrt(var_c + EPS), up)

    # ---- AdaIN + activation + nearest-upsampled residual (pre-shuffle layout) ----
    mu2 = aff_ref[0, 2:3, :]
    sig2 = aff_ref[0, 3:4, :]
    g = _leaky(g * _tile_lanes(sig2, up) + _tile_lanes(mu2, up), neg_slope)
    g = g + _tile_lanes(x.astype(jnp.float32), up)    # residual: out[t, c] added to every phase
    o_ref[0] = g.astype(o_ref.dtype)


def _out_kernel(x_ref, w_ref, b_ref, o_ref):
    o_ref[0] = (jnp.dot(x_ref[0], w_ref[...], preferred_element_type=jnp.float32)
                + b_ref[...]).astype(o_ref.dtype)


# ------------------------------ pallas_call wrappers ---------------------------

def _compiler_params():
    return pltpu.CompilerParams(dimension_semantics=("parallel",),
                                vmem_limit_bytes=VMEM_LIMIT)


def in_conv(x, w, b, neg_slope):
    B, T, Cin = x.shape
    Cout = w.shape[1]
    return pl.pallas_call(
        functools.partial(_in_kernel, neg_slope=neg_slope),
        out_shape=jax.ShapeDtypeStruct((B, T, Cout), ACT_DTYPE),
        grid=(B,),
        in_specs=[
            pl.BlockSpec((1, T, Cin), lambda i: (i, 0, 0)),
            pl.BlockSpec((Cin, Cout), lambda i: (0, 0)),
            pl.BlockSpec((1, Cout), lambda i: (0, 0)),
        ],
        out_specs=pl.BlockSpec((1, T, Cout), lambda i: (i, 0, 0)),
        compiler_params=_compiler_params(),
    )(x, w, b)


def decoder_block(x, w1, b1, w2, b2, aff, *, K, up, neg_slope):
    B, T, C = x.shape
    return pl.pallas_call(
        functools.partial(_block_kernel, K=K, up=up, neg_slope=neg_slope),
        out_shape=jax.ShapeDtypeStruct((B, T, up * C), ACT_DTYPE),
        grid=(B,),
        in_specs=[
            pl.BlockSpec((1, T, C), lambda i: (i, 0, 0)),
            pl.BlockSpec(w1.shape, lambda i: (0, 0)),
            pl.BlockSpec((1, C), lambda i: (0, 0)),
            pl.BlockSpec(w2.shape, lambda i: (0, 0)),
            pl.BlockSpec((1, up * C), lambda i: (0, 0)),
            pl.BlockSpec((1, 4, C), lambda i: (i, 0, 0)),
        ],
        out_specs=pl.BlockSpec((1, T, up * C), lambda i: (i, 0, 0)),
        scratch_shapes=[pltpu.VMEM((T + K - 1, C), jnp.float32)],
        compiler_params=_compiler_params(),
    )(x, w1, b1, w2, b2, aff)


def out_conv(x, w, b):
    B, T, C = x.shape
    Cout = w.shape[1]
    return pl.pallas_call(
        _out_kernel,
        out_shape=jax.ShapeDtypeStruct((B, T, Cout), jnp.float32),
        grid=(B,),
        in_specs=[
            pl.BlockSpec((1, T, C), lambda i: (i, 0, 0)),
            pl.BlockSpec((C, Cout), lambda i: (0, 0)),
            pl.BlockSpec((1, Cout), lambda i: (0, 0)),
        ],
        out_specs=pl.BlockSpec((1, T, Cout), lambda i: (i, 0, 0)),
        compiler_params=_compiler_params(),
    )(x, w, b)


# ------------------------- parameter init (PyTorch layout) ---------------------

def init_decoder_params(key, c_in, c_cond, c_h, c_out, kernel_size, n_conv_blocks, upsample):
    """Synthetic params in native PyTorch layouts: Conv1d (Cout, Cin, K), Linear (out, in)."""
    keys = iter(jax.random.split(key, 64))

    def conv(cout, cin, k):
        s = 1.0 / jnp.sqrt(float(cin * k))
        return s * jax.random.normal(next(keys), (cout, cin, k), jnp.float32)

    def vec(n):
        return 0.01 * jax.random.normal(next(keys), (n,), jnp.float32)

    p = {"in_w": conv(c_h, c_in, 1), "in_b": vec(c_h),
         "first_w": [], "first_b": [], "second_w": [], "second_b": [],
         "aff_w": [], "aff_b": [],
         "out_w": conv(c_out, c_h, 1), "out_b": vec(c_out)}
    for l in range(n_conv_blocks):
        p["first_w"].append(conv(c_h, c_h, kernel_size))
        p["first_b"].append(vec(c_h))
        p["second_w"].append(conv(c_h * upsample[l], c_h, kernel_size))
        p["second_b"].append(vec(c_h * upsample[l]))
    for _ in range(2 * n_conv_blocks):
        s = 1.0 / jnp.sqrt(float(c_cond))
        p["aff_w"].append(s * jax.random.normal(next(keys), (2 * c_h, c_cond), jnp.float32))
        p["aff_b"].append(1.0 + 0.01 * jax.random.normal(next(keys), (2 * c_h,), jnp.float32))
    return p


# --------------------------- weight packing for the TPU ------------------------

def _pack_conv(w_t, b_t, *, up, cin_pad, cout_pad):
    """PyTorch (Cout_total, Cin, K) -> lane-padded im2col matrix (K*cin_pad, up*cout_pad).

    Output columns are ordered [phase r, channel c] so pixel_shuffle_1d becomes a free
    reshape of the kernel output; padded rows/cols/bias are zero so padded lanes stay
    exactly zero through conv / InstanceNorm / AdaIN / residual."""
    cout_total, cin, K = w_t.shape
    cout = cout_total // up
    w4 = jnp.transpose(w_t.astype(jnp.float32).reshape(cout, up, cin, K), (3, 2, 1, 0))
    w = jnp.zeros((K, cin_pad, up, cout_pad), jnp.float32).at[:, :cin, :, :cout].set(w4)
    b = jnp.zeros((up, cout_pad), jnp.float32).at[:, :cout].set(
        b_t.astype(jnp.float32).reshape(cout, up).T)
    return w.reshape(K * cin_pad, up * cout_pad).astype(ACT_DTYPE), b.reshape(1, up * cout_pad)


def pack_decoder_params(p, *, c_in, c_h, c_out, n_conv_blocks, upsample):
    cp = _round_up(c_h, LANE)
    cin_p = _round_up(c_in, LANE)
    cout_p = _round_up(c_out, LANE)
    packed = {"first_w": [], "first_b": [], "second_w": [], "second_b": []}
    packed["in_w"], packed["in_b"] = _pack_conv(p["in_w"], p["in_b"], up=1,
                                                cin_pad=cin_p, cout_pad=cp)
    for l in range(n_conv_blocks):
        w1, b1 = _pack_conv(p["first_w"][l], p["first_b"][l], up=1, cin_pad=cp, cout_pad=cp)
        w2, b2 = _pack_conv(p["second_w"][l], p["second_b"][l], up=upsample[l],
                            cin_pad=cp, cout_pad=cp)
        packed["first_w"].append(w1)
        packed["first_b"].append(b1)
        packed["second_w"].append(w2)
        packed["second_b"].append(b2)
    packed["out_w"], packed["out_b"] = _pack_conv(p["out_w"], p["out_b"], up=1,
                                                  cin_pad=cp, cout_pad=cout_p)
    # All 2*n_conv_blocks AdaIN affine Linear layers stacked into one matmul.
    packed["aff_w"] = jnp.concatenate([w.T.astype(jnp.float32) for w in p["aff_w"]], axis=1)
    packed["aff_b"] = jnp.concatenate([b.astype(jnp.float32) for b in p["aff_b"]], axis=0)
    return packed


# ------------------------------- decoder forward -------------------------------

def decoder_forward(packed, z, cond, *, c_h, c_out, n_conv_blocks, upsample, act="relu"):
    """z: (B, c_in, T) NCW like PyTorch; cond: (B, c_cond) -> (B, c_out, T*prod(upsample))."""
    neg = 0.01 if act == "lrelu" else 0.0            # nn.LeakyReLU default / nn.ReLU
    B, c_in, T = z.shape
    cp = packed["in_b"].shape[1]                     # lane-padded c_h
    cin_p = packed["in_w"].shape[0]                  # lane-padded c_in (K = 1)

    # channels-last, lane-padded, bf16 activations
    x = jnp.transpose(z, (0, 2, 1))
    x = jnp.pad(x, ((0, 0), (0, 0), (0, cin_p - c_in))).astype(ACT_DTYPE)

    out = in_conv(x, packed["in_w"], packed["in_b"], neg)                    # (B, T, cp)

    # all AdaIN affines in one small matmul (instead of 2*n_conv_blocks pallas_calls)
    aff_all = cond.astype(jnp.float32) @ packed["aff_w"] + packed["aff_b"]

    def _aff(idx):
        o = idx * 2 * c_h
        mu = aff_all[:, o:o + c_h]
        sg = aff_all[:, o + c_h:o + 2 * c_h]
        pad = ((0, 0), (0, cp - c_h))
        return jnp.pad(mu, pad), jnp.pad(sg, pad)    # padded mu lanes stay exactly zero

    for l in range(n_conv_blocks):
        up = upsample[l]
        K = packed["first_w"][l].shape[0] // cp
        mu1, sg1 = _aff(2 * l)
        mu2, sg2 = _aff(2 * l + 1)
        aff_blk = jnp.stack([mu1, sg1, mu2, sg2], axis=1)                    # (B, 4, cp) f32
        y = decoder_block(out, packed["first_w"][l], packed["first_b"][l],
                          packed["second_w"][l], packed["second_b"][l], aff_blk,
                          K=K, up=up, neg_slope=neg)                         # (B, T, up*cp)
        T = T * up
        out = y.reshape(B, T, cp)    # pixel_shuffle_1d: free reshape (columns ordered [r, c])

    y = out_conv(out, packed["out_w"], packed["out_b"])                      # (B, T, cout_p)
    return jnp.transpose(y[:, :, :c_out], (0, 2, 1))                         # back to NCW


# ------------------------- pure-JAX reference (f32, NCW) -----------------------

def _ref_conv1d(x, w, b):
    """PyTorch Conv1d (cross-correlation) with pad_layer reflect padding. x: (B, C, T)."""
    K = w.shape[2]
    pad_l, pad_r = _pad_amounts(K)
    if K > 1:
        x = jnp.pad(x, ((0, 0), (0, 0), (pad_l, pad_r)), mode="reflect")
    T = x.shape[2] - K + 1
    y = sum(jnp.einsum("bct,oc->bot", x[:, :, k:k + T], w[:, :, k]) for k in range(K))
    return y + b[None, :, None]


def decoder_reference(p, z, cond, *, n_conv_blocks, upsample, act="relu"):
    neg = 0.01 if act == "lrelu" else 0.0
    c_h = p["in_w"].shape[0]

    def norm(x):
        m = jnp.mean(x, axis=2, keepdims=True)
        v = jnp.mean((x - m) ** 2, axis=2, keepdims=True)
        return (x - m) * jax.lax.rsqrt(v + EPS)

    def act_fn(x):
        return jnp.where(x >= 0, x, neg * x)

    def ada(x, aff):
        mu, sg = aff[:, :c_h], aff[:, c_h:]
        return x * sg[:, :, None] + mu[:, :, None]

    out = act_fn(norm(_ref_conv1d(z, p["in_w"], p["in_b"])))
    for l in range(n_conv_blocks):
        up = upsample[l]
        a1 = cond @ p["aff_w"][2 * l].T + p["aff_b"][2 * l]
        a2 = cond @ p["aff_w"][2 * l + 1].T + p["aff_b"][2 * l + 1]
        y = _ref_conv1d(out, p["first_w"][l], p["first_b"][l])
        y = act_fn(ada(norm(y), a1))
        y = _ref_conv1d(y, p["second_w"][l], p["second_b"][l])
        if up > 1:
            B, Ct, T = y.shape
            y = y.reshape(B, Ct // up, up, T).transpose(0, 1, 3, 2).reshape(B, Ct // up, T * up)
            out = jnp.repeat(out, up, axis=2)
        y = act_fn(ada(norm(y), a2))
        out = y + out
    return _ref_conv1d(out, p["out_w"], p["out_b"])


# ---------------------------------- main ---------------------------------------

if __name__ == "__main__":
    B, c_in, c_cond, c_h, c_out = 2, 4, 8, 32, 4
    kernel_size, n_conv_blocks = 5, 2
    upsample_cfg = (2, 1)
    T = 16

    key = jax.random.PRNGKey(0)
    k_param, k_z, k_cond = jax.random.split(key, 3)

    params = init_decoder_params(k_param, c_in, c_cond, c_h, c_out,
                                 kernel_size, n_conv_blocks, upsample_cfg)
    z = jax.random.normal(k_z, (B, c_in, T), jnp.float32)        # PyTorch NCW input
    cond = jax.random.normal(k_cond, (B, c_cond), jnp.float32)   # speaker embedding

    packed = pack_decoder_params(params, c_in=c_in, c_h=c_h, c_out=c_out,
                                 n_conv_blocks=n_conv_blocks, upsample=upsample_cfg)

    fwd = jax.jit(functools.partial(decoder_forward, c_h=c_h, c_out=c_out,
                                    n_conv_blocks=n_conv_blocks,
                                    upsample=upsample_cfg, act="relu"))
    out = jax.block_until_ready(fwd(packed, z, cond))

    expected_T = T
    for u in upsample_cfg:
        expected_T *= u
    assert out.shape == (B, c_out, expected_T), out.shape
    assert bool(jnp.all(jnp.isfinite(out)))

    # pure-JAX f32 reference (mirrors the PyTorch forward); loose tol for the bf16 MXU path
    ref = decoder_reference(params, z, cond, n_conv_blocks=n_conv_blocks,
                            upsample=upsample_cfg, act="relu")
    diff = out - ref
    rel = float(jnp.sqrt(jnp.mean(diff * diff)) / (jnp.sqrt(jnp.mean(ref * ref)) + 1e-8))
    assert rel < 0.1, f"relative RMSE vs reference too high: {rel}"

    print("KERNEL_OK")
</pallas_src>

<mosaic_0001>
module attributes {stable_mosaic.version = 11 : i64} {
  func.func @_in_kernel(%arg0: i32, %arg1: memref<1x16x128xbf16, #tpu.memory_space<vmem>>, %arg2: memref<128x128xbf16, #tpu.memory_space<vmem>>, %arg3: memref<1x128xf32, #tpu.memory_space<vmem>>, %arg4: memref<1x16x128xbf16, #tpu.memory_space<vmem>>) attributes {dimension_semantics = [#tpu.dimension_semantics<parallel>], iteration_bounds = array<i64: 2>, scalar_prefetch = 0 : i64, scratch_operands = 0 : i64, tpu.core_type = #tpu.core_type<tc>, window_params = [{transform_indices = @transform_0, window_bounds = array<i64: 1, 16, 128>}, {pipeline_mode = #tpu.pipeline_mode<synchronous>, transform_indices = @transform_1, window_bounds = array<i64: 128, 128>}, {pipeline_mode = #tpu.pipeline_mode<synchronous>, transform_indices = @transform_2, window_bounds = array<i64: 1, 128>}, {transform_indices = @transform_3, window_bounds = array<i64: 1, 16, 128>}]} {
    %c0 = arith.constant 0 : index
    %c0_0 = arith.constant 0 : index
    %c0_1 = arith.constant 0 : index
    %0 = vector.load %arg1[%c0, %c0_0, %c0_1] : memref<1x16x128xbf16, #tpu.memory_space<vmem>>, vector<1x16x128xbf16>
    %1 = vector.shape_cast %0 : vector<1x16x128xbf16> to vector<16x128xbf16>
    %c0_2 = arith.constant 0 : index
    %c0_3 = arith.constant 0 : index
    %2 = vector.load %arg2[%c0_2, %c0_3] : memref<128x128xbf16, #tpu.memory_space<vmem>>, vector<128x128xbf16>
    %cst = arith.constant dense<0.000000e+00> : vector<16x128xf32>
    %3 = tpu.matmul %1, %2, %cst {dimension_numbers = #tpu.dot_dimension_numbers<[1], [0], [0], [1], [0, 0, 1, 1], [], []>} : vector<16x128xbf16>, vector<128x128xbf16>, vector<16x128xf32> -> vector<16x128xf32>
    %c0_4 = arith.constant 0 : index
    %c0_5 = arith.constant 0 : index
    %4 = vector.load %arg3[%c0_4, %c0_5] : memref<1x128xf32, #tpu.memory_space<vmem>>, vector<1x128xf32>
    %5 = vector.broadcast %4 : vector<1x128xf32> to vector<16x128xf32>
    %6 = arith.addf %3, %5 : vector<16x128xf32>
    %cst_6 = arith.constant dense<0.000000e+00> : vector<128xf32>
    %7 = vector.multi_reduction <add>, %6, %cst_6 [0] : vector<16x128xf32> to vector<128xf32>
    %8 = vector.shape_cast %7 : vector<128xf32> to vector<1x128xf32>
    %cst_7 = arith.constant 1.600000e+01 : f32
    %9 = vector.broadcast %cst_7 : f32 to vector<1x128xf32>
    %10 = arith.divf %8, %9 : vector<1x128xf32>
    %11 = vector.broadcast %10 : vector<1x128xf32> to vector<16x128xf32>
    %12 = arith.subf %6, %11 : vector<16x128xf32>
    %13 = arith.mulf %12, %12 : vector<16x128xf32>
    %cst_8 = arith.constant dense<0.000000e+00> : vector<128xf32>
    %14 = vector.multi_reduction <add>, %13, %cst_8 [0] : vector<16x128xf32> to vector<128xf32>
    %15 = vector.shape_cast %14 : vector<128xf32> to vector<1x128xf32>
    %cst_9 = arith.constant 1.600000e+01 : f32
    %16 = vector.broadcast %cst_9 : f32 to vector<1x128xf32>
    %17 = arith.divf %15, %16 : vector<1x128xf32>
    %cst_10 = arith.constant 9.99999974E-6 : f32
    %18 = vector.broadcast %cst_10 : f32 to vector<1x128xf32>
    %19 = arith.addf %17, %18 : vector<1x128xf32>
    %20 = math.rsqrt %19 : vector<1x128xf32>
    %21 = vector.broadcast %20 : vector<1x128xf32> to vector<16x128xf32>
    %22 = arith.mulf %12, %21 : vector<16x128xf32>
    %cst_11 = arith.constant 0.000000e+00 : f32
    %23 = vector.broadcast %cst_11 : f32 to vector<16x128xf32>
    %24 = arith.cmpf oge, %22, %23 : vector<16x128xf32>
    %cst_12 = arith.constant 0.000000e+00 : f32
    %25 = vector.broadcast %cst_12 : f32 to vector<16x128xf32>
    %26 = arith.mulf %25, %22 : vector<16x128xf32>
    %27 = arith.select %24, %22, %26 : vector<16x128xi1>, vector<16x128xf32>
    %28 = arith.truncf %27 : vector<16x128xf32> to vector<16x128xbf16>
    %c0_13 = arith.constant 0 : index
    %c0_14 = arith.constant 0 : index
    %c0_15 = arith.constant 0 : index
    %29 = vector.load %arg4[%c0_13, %c0_14, %c0_15] : memref<1x16x128xbf16, #tpu.memory_space<vmem>>, vector<1x16x128xbf16>
    %30 = vector.shape_cast %29 : vector<1x16x128xbf16> to vector<16x128xbf16>
    %31 = vector.shape_cast %28 : vector<16x128xbf16> to vector<1x16x128xbf16>
    tpu.vector_store %arg4[%c0_13, %c0_14, %c0_15], %31 {strides = array<i32>} : memref<1x16x128xbf16, #tpu.memory_space<vmem>>, vector<1x16x128xbf16>,
    return
  }
  func.func @transform_0(%arg0: i32) -> (i32, i32, i32) {
    %c0_i32 = arith.constant 0 : i32
    %c0_i32_0 = arith.constant 0 : i32
    %c0_i32_1 = arith.constant 0 : i32
    return %arg0, %c0_i32, %c0_i32_0 : i32, i32, i32
  }
  func.func @transform_1(%arg0: i32) -> (i32, i32) {
    %c0_i32 = arith.constant 0 : i32
    %c0_i32_0 = arith.constant 0 : i32
    %c0_i32_1 = arith.constant 0 : i32
    return %c0_i32, %c0_i32_0 : i32, i32
  }
  func.func @transform_2(%arg0: i32) -> (i32, i32) {
    %c0_i32 = arith.constant 0 : i32
    %c0_i32_0 = arith.constant 0 : i32
    %c0_i32_1 = arith.constant 0 : i32
    return %c0_i32, %c0_i32_0 : i32, i32
  }
  func.func @transform_3(%arg0: i32) -> (i32, i32, i32) {
    %c0_i32 = arith.constant 0 : i32
    %c0_i32_0 = arith.constant 0 : i32
    %c0_i32_1 = arith.constant 0 : i32
    return %arg0, %c0_i32, %c0_i32_0 : i32, i32, i32
  }
}

module attributes {stable_mosaic.version = 11 : i64} {
  func.func @_out_kernel(%arg0: i32, %arg1: memref<1x32x128xbf16, #tpu.memory_space<vmem>>, %arg2: memref<128x128xbf16, #tpu.memory_space<vmem>>, %arg3: memref<1x128xf32, #tpu.memory_space<vmem>>, %arg4: memref<1x32x128xf32, #tpu.memory_space<vmem>>) attributes {dimension_semantics = [#tpu.dimension_semantics<parallel>], iteration_bounds = array<i64: 2>, scalar_prefetch = 0 : i64, scratch_operands = 0 : i64, tpu.core_type = #tpu.core_type<tc>, window_params = [{transform_indices = @transform_0, window_bounds = array<i64: 1, 32, 128>}, {pipeline_mode = #tpu.pipeline_mode<synchronous>, transform_indices = @transform_1, window_bounds = array<i64: 128, 128>}, {pipeline_mode = #tpu.pipeline_mode<synchronous>, transform_indices = @transform_2, window_bounds = array<i64: 1, 128>}, {transform_indices = @transform_3, window_bounds = array<i64: 1, 32, 128>}]} {
    %c0 = arith.constant 0 : index
    %c0_0 = arith.constant 0 : index
    %c0_1 = arith.constant 0 : index
    %0 = vector.load %arg1[%c0, %c0_0, %c0_1] : memref<1x32x128xbf16, #tpu.memory_space<vmem>>, vector<1x32x128xbf16>
    %1 = vector.shape_cast %0 : vector<1x32x128xbf16> to vector<32x128xbf16>
    %c0_2 = arith.constant 0 : index
    %c0_3 = arith.constant 0 : index
    %2 = vector.load %arg2[%c0_2, %c0_3] : memref<128x128xbf16, #tpu.memory_space<vmem>>, vector<128x128xbf16>
    %cst = arith.constant dense<0.000000e+00> : vector<32x128xf32>
    %3 = tpu.matmul %1, %2, %cst {dimension_numbers = #tpu.dot_dimension_numbers<[1], [0], [0], [1], [0, 0, 1, 1], [], []>} : vector<32x128xbf16>, vector<128x128xbf16>, vector<32x128xf32> -> vector<32x128xf32>
    %c0_4 = arith.constant 0 : index
    %c0_5 = arith.constant 0 : index
    %4 = vector.load %arg3[%c0_4, %c0_5] : memref<1x128xf32, #tpu.memory_space<vmem>>, vector<1x128xf32>
    %5 = vector.broadcast %4 : vector<1x128xf32> to vector<32x128xf32>
    %6 = arith.addf %3, %5 : vector<32x128xf32>
    %c0_6 = arith.constant 0 : index
    %c0_7 = arith.constant 0 : index
    %c0_8 = arith.constant 0 : index
    %7 = vector.load %arg4[%c0_6, %c0_7, %c0_8] : memref<1x32x128xf32, #tpu.memory_space<vmem>>, vector<1x32x128xf32>
    %8 = vector.shape_cast %7 : vector<1x32x128xf32> to vector<32x128xf32>
    %9 = vector.shape_cast %6 : vector<32x128xf32> to vector<1x32x128xf32>
    tpu.vector_store %arg4[%c0_6, %c0_7, %c0_8], %9 {strides = array<i32>} : memref<1x32x128xf32, #tpu.memory_space<vmem>>, vector<1x32x128xf32>,
    return
  }
  func.func @transform_0(%arg0: i32) -> (i32, i32, i32) {
    %c0_i32 = arith.constant 0 : i32
    %c0_i32_0 = arith.constant 0 : i32
    %c0_i32_1 = arith.constant 0 : i32
    return %arg0, %c0_i32, %c0_i32_0 : i32, i32, i32
  }
  func.func @transform_1(%arg0: i32) -> (i32, i32) {
    %c0_i32 = arith.constant 0 : i32
    %c0_i32_0 = arith.constant 0 : i32
    %c0_i32_1 = arith.constant 0 : i32
    return %c0_i32, %c0_i32_0 : i32, i32
  }
  func.func @transform_2(%arg0: i32) -> (i32, i32) {
    %c0_i32 = arith.constant 0 : i32
    %c0_i32_0 = arith.constant 0 : i32
    %c0_i32_1 = arith.constant 0 : i32
    return %c0_i32, %c0_i32_0 : i32, i32
  }
  func.func @transform_3(%arg0: i32) -> (i32, i32, i32) {
    %c0_i32 = arith.constant 0 : i32
    %c0_i32_0 = arith.constant 0 : i32
    %c0_i32_1 = arith.constant 0 : i32
    return %arg0, %c0_i32, %c0_i32_0 : i32, i32, i32
  }
}

module attributes {stable_mosaic.version = 11 : i64} {
  func.func @_block_kernel(%arg0: i32, %arg1: memref<1x32x128xbf16, #tpu.memory_space<vmem>>, %arg2: memref<640x128xbf16, #tpu.memory_space<vmem>>, %arg3: memref<1x128xf32, #tpu.memory_space<vmem>>, %arg4: memref<640x128xbf16, #tpu.memory_space<vmem>>, %arg5: memref<1x128xf32, #tpu.memory_space<vmem>>, %arg6: memref<1x4x128xf32, #tpu.memory_space<vmem>>, %arg7: memref<1x32x128xbf16, #tpu.memory_space<vmem>>, %arg8: memref<36x128xf32, #tpu.memory_space<vmem>>) attributes {dimension_semantics = [#tpu.dimension_semantics<parallel>], iteration_bounds = array<i64: 2>, scalar_prefetch = 0 : i64, scratch_operands = 1 : i64, tpu.core_type = #tpu.core_type<tc>, window_params = [{transform_indices = @transform_0, window_bounds = array<i64: 1, 32, 128>}, {pipeline_mode = #tpu.pipeline_mode<synchronous>, transform_indices = @transform_1, window_bounds = array<i64: 640, 128>}, {pipeline_mode = #tpu.pipeline_mode<synchronous>, transform_indices = @transform_2, window_bounds = array<i64: 1, 128>}, {pipeline_mode = #tpu.pipeline_mode<synchronous>, transform_indices = @transform_3, window_bounds = array<i64: 640, 128>}, {pipeline_mode = #tpu.pipeline_mode<synchronous>, transform_indices = @transform_4, window_bounds = array<i64: 1, 128>}, {transform_indices = @transform_5, window_bounds = array<i64: 1, 4, 128>}, {transform_indices = @transform_6, window_bounds = array<i64: 1, 32, 128>}]} {
    %c0 = arith.constant 0 : index
    %c0_0 = arith.constant 0 : index
    %c0_1 = arith.constant 0 : index
    %0 = vector.load %arg1[%c0, %c0_0, %c0_1] : memref<1x32x128xbf16, #tpu.memory_space<vmem>>, vector<1x32x128xbf16>
    %1 = vector.shape_cast %0 : vector<1x32x128xbf16> to vector<32x128xbf16>
    %2 = arith.extf %1 : vector<32x128xbf16> to vector<32x128xf32>
    %c2 = arith.constant 2 : index
    %c0_2 = arith.constant 0 : index
    %3 = vector.load %arg8[%c2, %c0_2] : memref<36x128xf32, #tpu.memory_space<vmem>>, vector<32x128xf32>
    tpu.vector_store %arg8[%c2, %c0_2], %2 {strides = array<i32>} : memref<36x128xf32, #tpu.memory_space<vmem>>, vector<32x128xf32>,
    %4 = vector.extract_strided_slice %2 {offsets = [2, 0], sizes = [1, 128], strides = [1, 1]} : vector<32x128xf32> to vector<1x128xf32>
    %c0_3 = arith.constant 0 : index
    %c0_4 = arith.constant 0 : index
    %5 = vector.load %arg8[%c0_3, %c0_4] : memref<36x128xf32, #tpu.memory_space<vmem>>, vector<1x128xf32>
    tpu.vector_store %arg8[%c0_3, %c0_4], %4 {strides = array<i32>} : memref<36x128xf32, #tpu.memory_space<vmem>>, vector<1x128xf32>,
    %6 = vector.extract_strided_slice %2 {offsets = [1, 0], sizes = [1, 128], strides = [1, 1]} : vector<32x128xf32> to vector<1x128xf32>
    %c1 = arith.constant 1 : index
    %c0_5 = arith.constant 0 : index
    %7 = vector.load %arg8[%c1, %c0_5] : memref<36x128xf32, #tpu.memory_space<vmem>>, vector<1x128xf32>
    tpu.vector_store %arg8[%c1, %c0_5], %6 {strides = array<i32>} : memref<36x128xf32, #tpu.memory_space<vmem>>, vector<1x128xf32>,
    %8 = vector.extract_strided_slice %2 {offsets = [30, 0], sizes = [1, 128], strides = [1, 1]} : vector<32x128xf32> to vector<1x128xf32>
    %c34 = arith.constant 34 : index
    %c0_6 = arith.constant 0 : index
    %9 = vector.load %arg8[%c34, %c0_6] : memref<36x128xf32, #tpu.memory_space<vmem>>, vector<1x128xf32>
    tpu.vector_store %arg8[%c34, %c0_6], %8 {strides = array<i32>} : memref<36x128xf32, #tpu.memory_space<vmem>>, vector<1x128xf32>,
    %10 = vector.extract_strided_slice %2 {offsets = [29, 0], sizes = [1, 128], strides = [1, 1]} : vector<32x128xf32> to vector<1x128xf32>
    %c35 = arith.constant 35 : index
    %c0_7 = arith.constant 0 : index
    %11 = vector.load %arg8[%c35, %c0_7] : memref<36x128xf32, #tpu.memory_space<vmem>>, vector<1x128xf32>
    tpu.vector_store %arg8[%c35, %c0_7], %10 {strides = array<i32>} : memref<36x128xf32, #tpu.memory_space<vmem>>, vector<1x128xf32>,
    %c0_8 = arith.constant 0 : index
    %c0_9 = arith.constant 0 : index
    %12 = vector.load %arg8[%c0_8, %c0_9] : memref<36x128xf32, #tpu.memory_space<vmem>>, vector<32x128xf32>
    %c1_10 = arith.constant 1 : index
    %c0_11 = arith.constant 0 : index
    %13 = vector.load %arg8[%c1_10, %c0_11] : memref<36x128xf32, #tpu.memory_space<vmem>>, vector<32x128xf32>
    %c2_12 = arith.constant 2 : index
    %c0_13 = arith.constant 0 : index
    %14 = vector.load %arg8[%c2_12, %c0_13] : memref<36x128xf32, #tpu.memory_space<vmem>>, vector<32x128xf32>
    %c3 = arith.constant 3 : index
    %c0_14 = arith.constant 0 : index
    %15 = vector.load %arg8[%c3, %c0_14] : memref<36x128xf32, #tpu.memory_space<vmem>>, vector<32x128xf32>
    %c4 = arith.constant 4 : index
    %c0_15 = arith.constant 0 : index
    %16 = vector.load %arg8[%c4, %c0_15] : memref<36x128xf32, #tpu.memory_space<vmem>>, vector<32x128xf32>
    %17 = tpu.concatenate %12, %13, %14, %15, %16 in 1 : vector<32x128xf32>, vector<32x128xf32>, vector<32x128xf32>, vector<32x128xf32>, vector<32x128xf32> -> vector<32x640xf32>
    %18 = arith.truncf %17 : vector<32x640xf32> to vector<32x640xbf16>
    %c0_16 = arith.constant 0 : index
    %c0_17 = arith.constant 0 : index
    %19 = vector.load %arg2[%c0_16, %c0_17] : memref<640x128xbf16, #tpu.memory_space<vmem>>, vector<640x128xbf16>
    %cst = arith.constant dense<0.000000e+00> : vector<32x128xf32>
    %20 = tpu.matmul %18, %19, %cst {dimension_numbers = #tpu.dot_dimension_numbers<[1], [0], [0], [1], [0, 0, 1, 1], [], []>} : vector<32x640xbf16>, vector<640x128xbf16>, vector<32x128xf32> -> vector<32x128xf32>
    %c0_18 = arith.constant 0 : index
    %c0_19 = arith.constant 0 : index
    %21 = vector.load %arg3[%c0_18, %c0_19] : memref<1x128xf32, #tpu.memory_space<vmem>>, vector<1x128xf32>
    %22 = vector.broadcast %21 : vector<1x128xf32> to vector<32x128xf32>
    %23 = arith.addf %20, %22 : vector<32x128xf32>
    %c0_20 = arith.constant 0 : index
    %c0_21 = arith.constant 0 : index
    %c0_22 = arith.constant 0 : index
    %24 = vector.load %arg6[%c0_20, %c0_21, %c0_22] : memref<1x4x128xf32, #tpu.memory_space<vmem>>, vector<1x1x128xf32>
    %25 = vector.shape_cast %24 : vector<1x1x128xf32> to vector<1x128xf32>
    %c0_23 = arith.constant 0 : index
    %c1_24 = arith.constant 1 : index
    %c0_25 = arith.constant 0 : index
    %26 = vector.load %arg6[%c0_23, %c1_24, %c0_25] : memref<1x4x128xf32, #tpu.memory_space<vmem>>, vector<1x1x128xf32>
    %27 = vector.shape_cast %26 : vector<1x1x128xf32> to vector<1x128xf32>
    %cst_26 = arith.constant dense<0.000000e+00> : vector<128xf32>
    %28 = vector.multi_reduction <add>, %23, %cst_26 [0] : vector<32x128xf32> to vector<128xf32>
    %29 = vector.shape_cast %28 : vector<128xf32> to vector<1x128xf32>
    %cst_27 = arith.constant 3.200000e+01 : f32
    %30 = vector.broadcast %cst_27 : f32 to vector<1x128xf32>
    %31 = arith.divf %29, %30 : vector<1x128xf32>
    %32 = vector.broadcast %31 : vector<1x128xf32> to vector<32x128xf32>
    %33 = arith.subf %23, %32 : vector<32x128xf32>
    %34 = arith.mulf %33, %33 : vector<32x128xf32>
    %cst_28 = arith.constant dense<0.000000e+00> : vector<128xf32>
    %35 = vector.multi_reduction <add>, %34, %cst_28 [0] : vector<32x128xf32> to vector<128xf32>
    %36 = vector.shape_cast %35 : vector<128xf32> to vector<1x128xf32>
    %cst_29 = arith.constant 3.200000e+01 : f32
    %37 = vector.broadcast %cst_29 : f32 to vector<1x128xf32>
    %38 = arith.divf %36, %37 : vector<1x128xf32>
    %cst_30 = arith.constant 9.99999974E-6 : f32
    %39 = vector.broadcast %cst_30 : f32 to vector<1x128xf32>
    %40 = arith.addf %38, %39 : vector<1x128xf32>
    %41 = math.rsqrt %40 : vector<1x128xf32>
    %42 = vector.broadcast %41 : vector<1x128xf32> to vector<32x128xf32>
    %43 = arith.mulf %33, %42 : vector<32x128xf32>
    %44 = vector.broadcast %27 : vector<1x128xf32> to vector<32x128xf32>
    %45 = arith.mulf %43, %44 : vector<32x128xf32>
    %46 = vector.broadcast %25 : vector<1x128xf32> to vector<32x128xf32>
    %47 = arith.addf %45, %46 : vector<32x128xf32>
    %cst_31 = arith.constant 0.000000e+00 : f32
    %48 = vector.broadcast %cst_31 : f32 to vector<32x128xf32>
    %49 = arith.cmpf oge, %47, %48 : vector<32x128xf32>
    %cst_32 = arith.constant 0.000000e+00 : f32
    %50 = vector.broadcast %cst_32 : f32 to vector<32x128xf32>
    %51 = arith.mulf %50, %47 : vector<32x128xf32>
    %52 = arith.select %49, %47, %51 : vector<32x128xi1>, vector<32x128xf32>
    %c2_33 = arith.constant 2 : index
    %c0_34 = arith.constant 0 : index
    %53 = vector.load %arg8[%c2_33, %c0_34] : memref<36x128xf32, #tpu.memory_space<vmem>>, vector<32x128xf32>
    tpu.vector_store %arg8[%c2_33, %c0_34], %52 {strides = array<i32>} : memref<36x128xf32, #tpu.memory_space<vmem>>, vector<32x128xf32>,
    %54 = vector.extract_strided_slice %52 {offsets = [2, 0], sizes = [1, 128], strides = [1, 1]} : vector<32x128xf32> to vector<1x128xf32>
    %c0_35 = arith.constant 0 : index
    %c0_36 = arith.constant 0 : index
    %55 = vector.load %arg8[%c0_35, %c0_36] : memref<36x128xf32, #tpu.memory_space<vmem>>, vector<1x128xf32>
    tpu.vector_store %arg8[%c0_35, %c0_36], %54 {strides = array<i32>} : memref<36x128xf32, #tpu.memory_space<vmem>>, vector<1x128xf32>,
    %56 = vector.extract_strided_slice %52 {offsets = [1, 0], sizes = [1, 128], strides = [1, 1]} : vector<32x128xf32> to vector<1x128xf32>
    %c1_37 = arith.constant 1 : index
    %c0_38 = arith.constant 0 : index
    %57 = vector.load %arg8[%c1_37, %c0_38] : memref<36x128xf32, #tpu.memory_space<vmem>>, vector<1x128xf32>
    tpu.vector_store %arg8[%c1_37, %c0_38], %56 {strides = array<i32>} : memref<36x128xf32, #tpu.memory_space<vmem>>, vector<1x128xf32>,
    %58 = vector.extract_strided_slice %52 {offsets = [30, 0], sizes = [1, 128], strides = [1, 1]} : vector<32x128xf32> to vector<1x128xf32>
    %c34_39 = arith.constant 34 : index
    %c0_40 = arith.constant 0 : index
    %59 = vector.load %arg8[%c34_39, %c0_40] : memref<36x128xf32, #tpu.memory_space<vmem>>, vector<1x128xf32>
    tpu.vector_store %arg8[%c34_39, %c0_40], %58 {strides = array<i32>} : memref<36x128xf32, #tpu.memory_space<vmem>>, vector<1x128xf32>,
    %60 = vector.extract_strided_slice %52 {offsets = [29, 0], sizes = [1, 128], strides = [1, 1]} : vector<32x128xf32> to vector<1x128xf32>
    %c35_41 = arith.constant 35 : index
    %c0_42 = arith.constant 0 : index
    %61 = vector.load %arg8[%c35_41, %c0_42] : memref<36x128xf32, #tpu.memory_space<vmem>>, vector<1x128xf32>
    tpu.vector_store %arg8[%c35_41, %c0_42], %60 {strides = array<i32>} : memref<36x128xf32, #tpu.memory_space<vmem>>, vector<1x128xf32>,
    %c0_43 = arith.constant 0 : index
    %c0_44 = arith.constant 0 : index
    %62 = vector.load %arg8[%c0_43, %c0_44] : memref<36x128xf32, #tpu.memory_space<vmem>>, vector<32x128xf32>
    %c1_45 = arith.constant 1 : index
    %c0_46 = arith.constant 0 : index
    %63 = vector.load %arg8[%c1_45, %c0_46] : memref<36x128xf32, #tpu.memory_space<vmem>>, vector<32x128xf32>
    %c2_47 = arith.constant 2 : index
    %c0_48 = arith.constant 0 : index
    %64 = vector.load %arg8[%c2_47, %c0_48] : memref<36x128xf32, #tpu.memory_space<vmem>>, vector<32x128xf32>
    %c3_49 = arith.constant 3 : index
    %c0_50 = arith.constant 0 : index
    %65 = vector.load %arg8[%c3_49, %c0_50] : memref<36x128xf32, #tpu.memory_space<vmem>>, vector<32x128xf32>
    %c4_51 = arith.constant 4 : index
    %c0_52 = arith.constant 0 : index
    %66 = vector.load %arg8[%c4_51, %c0_52] : memref<36x128xf32, #tpu.memory_space<vmem>>, vector<32x128xf32>
    %67 = tpu.concatenate %62, %63, %64, %65, %66 in 1 : vector<32x128xf32>, vector<32x128xf32>, vector<32x128xf32>, vector<32x128xf32>, vector<32x128xf32> -> vector<32x640xf32>
    %68 = arith.truncf %67 : vector<32x640xf32> to vector<32x640xbf16>
    %c0_53 = arith.constant 0 : index
    %c0_54 = arith.constant 0 : index
    %69 = vector.load %arg4[%c0_53, %c0_54] : memref<640x128xbf16, #tpu.memory_space<vmem>>, vector<640x128xbf16>
    %cst_55 = arith.constant dense<0.000000e+00> : vector<32x128xf32>
    %70 = tpu.matmul %68, %69, %cst_55 {dimension_numbers = #tpu.dot_dimension_numbers<[1], [0], [0], [1], [0, 0, 1, 1], [], []>} : vector<32x640xbf16>, vector<640x128xbf16>, vector<32x128xf32> -> vector<32x128xf32>
    %c0_56 = arith.constant 0 : index
    %c0_57 = arith.constant 0 : index
    %71 = vector.load %arg5[%c0_56, %c0_57] : memref<1x128xf32, #tpu.memory_space<vmem>>, vector<1x128xf32>
    %72 = vector.broadcast %71 : vector<1x128xf32> to vector<32x128xf32>
    %73 = arith.addf %70, %72 : vector<32x128xf32>
    %cst_58 = arith.constant dense<0.000000e+00> : vector<128xf32>
    %74 = vector.multi_reduction <add>, %73, %cst_58 [0] : vector<32x128xf32> to vector<128xf32>
    %75 = vector.shape_cast %74 : vector<128xf32> to vector<1x128xf32>
    %cst_59 = arith.constant 3.200000e+01 : f32
    %76 = vector.broadcast %cst_59 : f32 to vector<1x128xf32>
    %77 = arith.divf %75, %76 : vector<1x128xf32>
    %cst_60 = arith.constant 1.000000e+00 : f32
    %78 = vector.broadcast %cst_60 : f32 to vector<1x128xf32>
    %79 = arith.divf %77, %78 : vector<1x128xf32>
    %80 = vector.broadcast %79 : vector<1x128xf32> to vector<32x128xf32>
    %81 = arith.subf %73, %80 : vector<32x128xf32>
    %82 = arith.mulf %81, %81 : vector<32x128xf32>
    %cst_61 = arith.constant dense<0.000000e+00> : vector<128xf32>
    %83 = vector.multi_reduction <add>, %82, %cst_61 [0] : vector<32x128xf32> to vector<128xf32>
    %84 = vector.shape_cast %83 : vector<128xf32> to vector<1x128xf32>
    %cst_62 = arith.constant 3.200000e+01 : f32
    %85 = vector.broadcast %cst_62 : f32 to vector<1x128xf32>
    %86 = arith.divf %84, %85 : vector<1x128xf32>
    %cst_63 = arith.constant 1.000000e+00 : f32
    %87 = vector.broadcast %cst_63 : f32 to vector<1x128xf32>
    %88 = arith.divf %86, %87 : vector<1x128xf32>
    %cst_64 = arith.constant 9.99999974E-6 : f32
    %89 = vector.broadcast %cst_64 : f32 to vector<1x128xf32>
    %90 = arith.addf %88, %89 : vector<1x128xf32>
    %91 = math.rsqrt %90 : vector<1x128xf32>
    %92 = vector.broadcast %91 : vector<1x128xf32> to vector<32x128xf32>
    %93 = arith.mulf %81, %92 : vector<32x128xf32>
    %c0_65 = arith.constant 0 : index
    %c2_66 = arith.constant 2 : index
    %c0_67 = arith.constant 0 : index
    %94 = vector.load %arg6[%c0_65, %c2_66, %c0_67] : memref<1x4x128xf32, #tpu.memory_space<vmem>>, vector<1x1x128xf32>
    %95 = vector.shape_cast %94 : vector<1x1x128xf32> to vector<1x128xf32>
    %c0_68 = arith.constant 0 : index
    %c3_69 = arith.constant 3 : index
    %c0_70 = arith.constant 0 : index
    %96 = vector.load %arg6[%c0_68, %c3_69, %c0_70] : memref<1x4x128xf32, #tpu.memory_space<vmem>>, vector<1x1x128xf32>
    %97 = vector.shape_cast %96 : vector<1x1x128xf32> to vector<1x128xf32>
    %98 = vector.broadcast %97 : vector<1x128xf32> to vector<32x128xf32>
    %99 = arith.mulf %93, %98 : vector<32x128xf32>
    %100 = vector.broadcast %95 : vector<1x128xf32> to vector<32x128xf32>
    %101 = arith.addf %99, %100 : vector<32x128xf32>
    %cst_71 = arith.constant 0.000000e+00 : f32
    %102 = vector.broadcast %cst_71 : f32 to vector<32x128xf32>
    %103 = arith.cmpf oge, %101, %102 : vector<32x128xf32>
    %cst_72 = arith.constant 0.000000e+00 : f32
    %104 = vector.broadcast %cst_72 : f32 to vector<32x128xf32>
    %105 = arith.mulf %104, %101 : vector<32x128xf32>
    %106 = arith.select %103, %101, %105 : vector<32x128xi1>, vector<32x128xf32>
    %107 = arith.extf %1 : vector<32x128xbf16> to vector<32x128xf32>
    %108 = arith.addf %106, %107 : vector<32x128xf32>
    %109 = arith.truncf %108 : vector<32x128xf32> to vector<32x128xbf16>
    %c0_73 = arith.constant 0 : index
    %c0_74 = arith.constant 0 : index
    %c0_75 = arith.constant 0 : index
    %110 = vector.load %arg7[%c0_73, %c0_74, %c0_75] : memref<1x32x128xbf16, #tpu.memory_space<vmem>>, vector<1x32x128xbf16>
    %111 = vector.shape_cast %110 : vector<1x32x128xbf16> to vector<32x128xbf16>
    %112 = vector.shape_cast %109 : vector<32x128xbf16> to vector<1x32x128xbf16>
    tpu.vector_store %arg7[%c0_73, %c0_74, %c0_75], %112 {strides = array<i32>} : memref<1x32x128xbf16, #tpu.memory_space<vmem>>, vector<1x32x128xbf16>,
    return
  }
  func.func @transform_0(%arg0: i32) -> (i32, i32, i32) {
    %c0_i32 = arith.constant 0 : i32
    %c0_i32_0 = arith.constant 0 : i32
    %c0_i32_1 = arith.constant 0 : i32
    return %arg0, %c0_i32, %c0_i32_0 : i32, i32, i32
  }
  func.func @transform_1(%arg0: i32) -> (i32, i32) {
    %c0_i32 = arith.constant 0 : i32
    %c0_i32_0 = arith.constant 0 : i32
    %c0_i32_1 = arith.constant 0 : i32
    return %c0_i32, %c0_i32_0 : i32, i32
  }
  func.func @transform_2(%arg0: i32) -> (i32, i32) {
    %c0_i32 = arith.constant 0 : i32
    %c0_i32_0 = arith.constant 0 : i32
    %c0_i32_1 = arith.constant 0 : i32
    return %c0_i32, %c0_i32_0 : i32, i32
  }
  func.func @transform_3(%arg0: i32) -> (i32, i32) {
    %c0_i32 = arith.constant 0 : i32
    %c0_i32_0 = arith.constant 0 : i32
    %c0_i32_1 = arith.constant 0 : i32
    return %c0_i32, %c0_i32_0 : i32, i32
  }
  func.func @transform_4(%arg0: i32) -> (i32, i32) {
    %c0_i32 = arith.constant 0 : i32
    %c0_i32_0 = arith.constant 0 : i32
    %c0_i32_1 = arith.constant 0 : i32
    return %c0_i32, %c0_i32_0 : i32, i32
  }
  func.func @transform_5(%arg0: i32) -> (i32, i32, i32) {
    %c0_i32 = arith.constant 0 : i32
    %c0_i32_0 = arith.constant 0 : i32
    %c0_i32_1 = arith.constant 0 : i32
    return %arg0, %c0_i32, %c0_i32_0 : i32, i32, i32
  }
  func.func @transform_6(%arg0: i32) -> (i32, i32, i32) {
    %c0_i32 = arith.constant 0 : i32
    %c0_i32_0 = arith.constant 0 : i32
    %c0_i32_1 = arith.constant 0 : i32
    return %arg0, %c0_i32, %c0_i32_0 : i32, i32, i32
  }
}

module attributes {stable_mosaic.version = 11 : i64} {
  func.func @_block_kernel(%arg0: i32, %arg1: memref<1x16x128xbf16, #tpu.memory_space<vmem>>, %arg2: memref<640x128xbf16, #tpu.memory_space<vmem>>, %arg3: memref<1x128xf32, #tpu.memory_space<vmem>>, %arg4: memref<640x256xbf16, #tpu.memory_space<vmem>>, %arg5: memref<1x256xf32, #tpu.memory_space<vmem>>, %arg6: memref<1x4x128xf32, #tpu.memory_space<vmem>>, %arg7: memref<1x16x256xbf16, #tpu.memory_space<vmem>>, %arg8: memref<20x128xf32, #tpu.memory_space<vmem>>) attributes {dimension_semantics = [#tpu.dimension_semantics<parallel>], iteration_bounds = array<i64: 2>, scalar_prefetch = 0 : i64, scratch_operands = 1 : i64, tpu.core_type = #tpu.core_type<tc>, window_params = [{transform_indices = @transform_0, window_bounds = array<i64: 1, 16, 128>}, {pipeline_mode = #tpu.pipeline_mode<synchronous>, transform_indices = @transform_1, window_bounds = array<i64: 640, 128>}, {pipeline_mode = #tpu.pipeline_mode<synchronous>, transform_indices = @transform_2, window_bounds = array<i64: 1, 128>}, {pipeline_mode = #tpu.pipeline_mode<synchronous>, transform_indices = @transform_3, window_bounds = array<i64: 640, 256>}, {pipeline_mode = #tpu.pipeline_mode<synchronous>, transform_indices = @transform_4, window_bounds = array<i64: 1, 256>}, {transform_indices = @transform_5, window_bounds = array<i64: 1, 4, 128>}, {transform_indices = @transform_6, window_bounds = array<i64: 1, 16, 256>}]} {
    %c0 = arith.constant 0 : index
    %c0_0 = arith.constant 0 : index
    %c0_1 = arith.constant 0 : index
    %0 = vector.load %arg1[%c0, %c0_0, %c0_1] : memref<1x16x128xbf16, #tpu.memory_space<vmem>>, vector<1x16x128xbf16>
    %1 = vector.shape_cast %0 : vector<1x16x128xbf16> to vector<16x128xbf16>
    %2 = arith.extf %1 : vector<16x128xbf16> to vector<16x128xf32>
    %c2 = arith.constant 2 : index
    %c0_2 = arith.constant 0 : index
    %3 = vector.load %arg8[%c2, %c0_2] : memref<20x128xf32, #tpu.memory_space<vmem>>, vector<16x128xf32>
    tpu.vector_store %arg8[%c2, %c0_2], %2 {strides = array<i32>} : memref<20x128xf32, #tpu.memory_space<vmem>>, vector<16x128xf32>,
    %4 = vector.extract_strided_slice %2 {offsets = [2, 0], sizes = [1, 128], strides = [1, 1]} : vector<16x128xf32> to vector<1x128xf32>
    %c0_3 = arith.constant 0 : index
    %c0_4 = arith.constant 0 : index
    %5 = vector.load %arg8[%c0_3, %c0_4] : memref<20x128xf32, #tpu.memory_space<vmem>>, vector<1x128xf32>
    tpu.vector_store %arg8[%c0_3, %c0_4], %4 {strides = array<i32>} : memref<20x128xf32, #tpu.memory_space<vmem>>, vector<1x128xf32>,
    %6 = vector.extract_strided_slice %2 {offsets = [1, 0], sizes = [1, 128], strides = [1, 1]} : vector<16x128xf32> to vector<1x128xf32>
    %c1 = arith.constant 1 : index
    %c0_5 = arith.constant 0 : index
    %7 = vector.load %arg8[%c1, %c0_5] : memref<20x128xf32, #tpu.memory_space<vmem>>, vector<1x128xf32>
    tpu.vector_store %arg8[%c1, %c0_5], %6 {strides = array<i32>} : memref<20x128xf32, #tpu.memory_space<vmem>>, vector<1x128xf32>,
    %8 = vector.extract_strided_slice %2 {offsets = [14, 0], sizes = [1, 128], strides = [1, 1]} : vector<16x128xf32> to vector<1x128xf32>
    %c18 = arith.constant 18 : index
    %c0_6 = arith.constant 0 : index
    %9 = vector.load %arg8[%c18, %c0_6] : memref<20x128xf32, #tpu.memory_space<vmem>>, vector<1x128xf32>
    tpu.vector_store %arg8[%c18, %c0_6], %8 {strides = array<i32>} : memref<20x128xf32, #tpu.memory_space<vmem>>, vector<1x128xf32>,
    %10 = vector.extract_strided_slice %2 {offsets = [13, 0], sizes = [1, 128], strides = [1, 1]} : vector<16x128xf32> to vector<1x128xf32>
    %c19 = arith.constant 19 : index
    %c0_7 = arith.constant 0 : index
    %11 = vector.load %arg8[%c19, %c0_7] : memref<20x128xf32, #tpu.memory_space<vmem>>, vector<1x128xf32>
    tpu.vector_store %arg8[%c19, %c0_7], %10 {strides = array<i32>} : memref<20x128xf32, #tpu.memory_space<vmem>>, vector<1x128xf32>,
    %c0_8 = arith.constant 0 : index
    %c0_9 = arith.constant 0 : index
    %12 = vector.load %arg8[%c0_8, %c0_9] : memref<20x128xf32, #tpu.memory_space<vmem>>, vector<16x128xf32>
    %c1_10 = arith.constant 1 : index
    %c0_11 = arith.constant 0 : index
    %13 = vector.load %arg8[%c1_10, %c0_11] : memref<20x128xf32, #tpu.memory_space<vmem>>, vector<16x128xf32>
    %c2_12 = arith.constant 2 : index
    %c0_13 = arith.constant 0 : index
    %14 = vector.load %arg8[%c2_12, %c0_13] : memref<20x128xf32, #tpu.memory_space<vmem>>, vector<16x128xf32>
    %c3 = arith.constant 3 : index
    %c0_14 = arith.constant 0 : index
    %15 = vector.load %arg8[%c3, %c0_14] : memref<20x128xf32, #tpu.memory_space<vmem>>, vector<16x128xf32>
    %c4 = arith.constant 4 : index
    %c0_15 = arith.constant 0 : index
    %16 = vector.load %arg8[%c4, %c0_15] : memref<20x128xf32, #tpu.memory_space<vmem>>, vector<16x128xf32>
    %17 = tpu.concatenate %12, %13, %14, %15, %16 in 1 : vector<16x128xf32>, vector<16x128xf32>, vector<16x128xf32>, vector<16x128xf32>, vector<16x128xf32> -> vector<16x640xf32>
    %18 = arith.truncf %17 : vector<16x640xf32> to vector<16x640xbf16>
    %c0_16 = arith.constant 0 : index
    %c0_17 = arith.constant 0 : index
    %19 = vector.load %arg2[%c0_16, %c0_17] : memref<640x128xbf16, #tpu.memory_space<vmem>>, vector<640x128xbf16>
    %cst = arith.constant dense<0.000000e+00> : vector<16x128xf32>
    %20 = tpu.matmul %18, %19, %cst {dimension_numbers = #tpu.dot_dimension_numbers<[1], [0], [0], [1], [0, 0, 1, 1], [], []>} : vector<16x640xbf16>, vector<640x128xbf16>, vector<16x128xf32> -> vector<16x128xf32>
    %c0_18 = arith.constant 0 : index
    %c0_19 = arith.constant 0 : index
    %21 = vector.load %arg3[%c0_18, %c0_19] : memref<1x128xf32, #tpu.memory_space<vmem>>, vector<1x128xf32>
    %22 = vector.broadcast %21 : vector<1x128xf32> to vector<16x128xf32>
    %23 = arith.addf %20, %22 : vector<16x128xf32>
    %c0_20 = arith.constant 0 : index
    %c0_21 = arith.constant 0 : index
    %c0_22 = arith.constant 0 : index
    %24 = vector.load %arg6[%c0_20, %c0_21, %c0_22] : memref<1x4x128xf32, #tpu.memory_space<vmem>>, vector<1x1x128xf32>
    %25 = vector.shape_cast %24 : vector<1x1x128xf32> to vector<1x128xf32>
    %c0_23 = arith.constant 0 : index
    %c1_24 = arith.constant 1 : index
    %c0_25 = arith.constant 0 : index
    %26 = vector.load %arg6[%c0_23, %c1_24, %c0_25] : memref<1x4x128xf32, #tpu.memory_space<vmem>>, vector<1x1x128xf32>
    %27 = vector.shape_cast %26 : vector<1x1x128xf32> to vector<1x128xf32>
    %cst_26 = arith.constant dense<0.000000e+00> : vector<128xf32>
    %28 = vector.multi_reduction <add>, %23, %cst_26 [0] : vector<16x128xf32> to vector<128xf32>
    %29 = vector.shape_cast %28 : vector<128xf32> to vector<1x128xf32>
    %cst_27 = arith.constant 1.600000e+01 : f32
    %30 = vector.broadcast %cst_27 : f32 to vector<1x128xf32>
    %31 = arith.divf %29, %30 : vector<1x128xf32>
    %32 = vector.broadcast %31 : vector<1x128xf32> to vector<16x128xf32>
    %33 = arith.subf %23, %32 : vector<16x128xf32>
    %34 = arith.mulf %33, %33 : vector<16x128xf32>
    %cst_28 = arith.constant dense<0.000000e+00> : vector<128xf32>
    %35 = vector.multi_reduction <add>, %34, %cst_28 [0] : vector<16x128xf32> to vector<128xf32>
    %36 = vector.shape_cast %35 : vector<128xf32> to vector<1x128xf32>
    %cst_29 = arith.constant 1.600000e+01 : f32
    %37 = vector.broadcast %cst_29 : f32 to vector<1x128xf32>
    %38 = arith.divf %36, %37 : vector<1x128xf32>
    %cst_30 = arith.constant 9.99999974E-6 : f32
    %39 = vector.broadcast %cst_30 : f32 to vector<1x128xf32>
    %40 = arith.addf %38, %39 : vector<1x128xf32>
    %41 = math.rsqrt %40 : vector<1x128xf32>
    %42 = vector.broadcast %41 : vector<1x128xf32> to vector<16x128xf32>
    %43 = arith.mulf %33, %42 : vector<16x128xf32>
    %44 = vector.broadcast %27 : vector<1x128xf32> to vector<16x128xf32>
    %45 = arith.mulf %43, %44 : vector<16x128xf32>
    %46 = vector.broadcast %25 : vector<1x128xf32> to vector<16x128xf32>
    %47 = arith.addf %45, %46 : vector<16x128xf32>
    %cst_31 = arith.constant 0.000000e+00 : f32
    %48 = vector.broadcast %cst_31 : f32 to vector<16x128xf32>
    %49 = arith.cmpf oge, %47, %48 : vector<16x128xf32>
    %cst_32 = arith.constant 0.000000e+00 : f32
    %50 = vector.broadcast %cst_32 : f32 to vector<16x128xf32>
    %51 = arith.mulf %50, %47 : vector<16x128xf32>
    %52 = arith.select %49, %47, %51 : vector<16x128xi1>, vector<16x128xf32>
    %c2_33 = arith.constant 2 : index
    %c0_34 = arith.constant 0 : index
    %53 = vector.load %arg8[%c2_33, %c0_34] : memref<20x128xf32, #tpu.memory_space<vmem>>, vector<16x128xf32>
    tpu.vector_store %arg8[%c2_33, %c0_34], %52 {strides = array<i32>} : memref<20x128xf32, #tpu.memory_space<vmem>>, vector<16x128xf32>,
    %54 = vector.extract_strided_slice %52 {offsets = [2, 0], sizes = [1, 128], strides = [1, 1]} : vector<16x128xf32> to vector<1x128xf32>
    %c0_35 = arith.constant 0 : index
    %c0_36 = arith.constant 0 : index
    %55 = vector.load %arg8[%c0_35, %c0_36] : memref<20x128xf32, #tpu.memory_space<vmem>>, vector<1x128xf32>
    tpu.vector_store %arg8[%c0_35, %c0_36], %54 {strides = array<i32>} : memref<20x128xf32, #tpu.memory_space<vmem>>, vector<1x128xf32>,
    %56 = vector.extract_strided_slice %52 {offsets = [1, 0], sizes = [1, 128], strides = [1, 1]} : vector<16x128xf32> to vector<1x128xf32>
    %c1_37 = arith.constant 1 : index
    %c0_38 = arith.constant 0 : index
    %57 = vector.load %arg8[%c1_37, %c0_38] : memref<20x128xf32, #tpu.memory_space<vmem>>, vector<1x128xf32>
    tpu.vector_store %arg8[%c1_37, %c0_38], %56 {strides = array<i32>} : memref<20x128xf32, #tpu.memory_space<vmem>>, vector<1x128xf32>,
    %58 = vector.extract_strided_slice %52 {offsets = [14, 0], sizes = [1, 128], strides = [1, 1]} : vector<16x128xf32> to vector<1x128xf32>
    %c18_39 = arith.constant 18 : index
    %c0_40 = arith.constant 0 : index
    %59 = vector.load %arg8[%c18_39, %c0_40] : memref<20x128xf32, #tpu.memory_space<vmem>>, vector<1x128xf32>
    tpu.vector_store %arg8[%c18_39, %c0_40], %58 {strides = array<i32>} : memref<20x128xf32, #tpu.memory_space<vmem>>, vector<1x128xf32>,
    %60 = vector.extract_strided_slice %52 {offsets = [13, 0], sizes = [1, 128], strides = [1, 1]} : vector<16x128xf32> to vector<1x128xf32>
    %c19_41 = arith.constant 19 : index
    %c0_42 = arith.constant 0 : index
    %61 = vector.load %arg8[%c19_41, %c0_42] : memref<20x128xf32, #tpu.memory_space<vmem>>, vector<1x128xf32>
    tpu.vector_store %arg8[%c19_41, %c0_42], %60 {strides = array<i32>} : memref<20x128xf32, #tpu.memory_space<vmem>>, vector<1x128xf32>,
    %c0_43 = arith.constant 0 : index
    %c0_44 = arith.constant 0 : index
    %62 = vector.load %arg8[%c0_43, %c0_44] : memref<20x128xf32, #tpu.memory_space<vmem>>, vector<16x128xf32>
    %c1_45 = arith.constant 1 : index
    %c0_46 = arith.constant 0 : index
    %63 = vector.load %arg8[%c1_45, %c0_46] : memref<20x128xf32, #tpu.memory_space<vmem>>, vector<16x128xf32>
    %c2_47 = arith.constant 2 : index
    %c0_48 = arith.constant 0 : index
    %64 = vector.load %arg8[%c2_47, %c0_48] : memref<20x128xf32, #tpu.memory_space<vmem>>, vector<16x128xf32>
    %c3_49 = arith.constant 3 : index
    %c0_50 = arith.constant 0 : index
    %65 = vector.load %arg8[%c3_49, %c0_50] : memref<20x128xf32, #tpu.memory_space<vmem>>, vector<16x128xf32>
    %c4_51 = arith.constant 4 : index
    %c0_52 = arith.constant 0 : index
    %66 = vector.load %arg8[%c4_51, %c0_52] : memref<20x128xf32, #tpu.memory_space<vmem>>, vector<16x128xf32>
    %67 = tpu.concatenate %62, %63, %64, %65, %66 in 1 : vector<16x128xf32>, vector<16x128xf32>, vector<16x128xf32>, vector<16x128xf32>, vector<16x128xf32> -> vector<16x640xf32>
    %68 = arith.truncf %67 : vector<16x640xf32> to vector<16x640xbf16>
    %c0_53 = arith.constant 0 : index
    %c0_54 = arith.constant 0 : index
    %69 = vector.load %arg4[%c0_53, %c0_54] : memref<640x256xbf16, #tpu.memory_space<vmem>>, vector<640x256xbf16>
    %cst_55 = arith.constant dense<0.000000e+00> : vector<16x256xf32>
    %70 = tpu.matmul %68, %69, %cst_55 {dimension_numbers = #tpu.dot_dimension_numbers<[1], [0], [0], [1], [0, 0, 1, 1], [], []>} : vector<16x640xbf16>, vector<640x256xbf16>, vector<16x256xf32> -> vector<16x256xf32>
    %c0_56 = arith.constant 0 : index
    %c0_57 = arith.constant 0 : index
    %71 = vector.load %arg5[%c0_56, %c0_57] : memref<1x256xf32, #tpu.memory_space<vmem>>, vector<1x256xf32>
    %72 = vector.broadcast %71 : vector<1x256xf32> to vector<16x256xf32>
    %73 = arith.addf %70, %72 : vector<16x256xf32>
    %cst_58 = arith.constant dense<0.000000e+00> : vector<256xf32>
    %74 = vector.multi_reduction <add>, %73, %cst_58 [0] : vector<16x256xf32> to vector<256xf32>
    %75 = vector.shape_cast %74 : vector<256xf32> to vector<1x256xf32>
    %cst_59 = arith.constant 1.600000e+01 : f32
    %76 = vector.broadcast %cst_59 : f32 to vector<1x256xf32>
    %77 = arith.divf %75, %76 : vector<1x256xf32>
    %78 = vector.extract_strided_slice %77 {offsets = [0, 0], sizes = [1, 128], strides = [1, 1]} : vector<1x256xf32> to vector<1x128xf32>
    %79 = vector.extract_strided_slice %77 {offsets = [0, 128], sizes = [1, 128], strides = [1, 1]} : vector<1x256xf32> to vector<1x128xf32>
    %80 = arith.addf %78, %79 : vector<1x128xf32>
    %cst_60 = arith.constant 2.000000e+00 : f32
    %81 = vector.broadcast %cst_60 : f32 to vector<1x128xf32>
    %82 = arith.divf %80, %81 : vector<1x128xf32>
    %83 = tpu.concatenate %82, %82 in 1 : vector<1x128xf32>, vector<1x128xf32> -> vector<1x256xf32>
    %84 = vector.broadcast %83 : vector<1x256xf32> to vector<16x256xf32>
    %85 = arith.subf %73, %84 : vector<16x256xf32>
    %86 = arith.mulf %85, %85 : vector<16x256xf32>
    %cst_61 = arith.constant dense<0.000000e+00> : vector<256xf32>
    %87 = vector.multi_reduction <add>, %86, %cst_61 [0] : vector<16x256xf32> to vector<256xf32>
    %88 = vector.shape_cast %87 : vector<256xf32> to vector<1x256xf32>
    %cst_62 = arith.constant 1.600000e+01 : f32
    %89 = vector.broadcast %cst_62 : f32 to vector<1x256xf32>
    %90 = arith.divf %88, %89 : vector<1x256xf32>
    %91 = vector.extract_strided_slice %90 {offsets = [0, 0], sizes = [1, 128], strides = [1, 1]} : vector<1x256xf32> to vector<1x128xf32>
    %92 = vector.extract_strided_slice %90 {offsets = [0, 128], sizes = [1, 128], strides = [1, 1]} : vector<1x256xf32> to vector<1x128xf32>
    %93 = arith.addf %91, %92 : vector<1x128xf32>
    %cst_63 = arith.constant 2.000000e+00 : f32
    %94 = vector.broadcast %cst_63 : f32 to vector<1x128xf32>
    %95 = arith.divf %93, %94 : vector<1x128xf32>
    %cst_64 = arith.constant 9.99999974E-6 : f32
    %96 = vector.broadcast %cst_64 : f32 to vector<1x128xf32>
    %97 = arith.addf %95, %96 : vector<1x128xf32>
    %98 = math.rsqrt %97 : vector<1x128xf32>
    %99 = tpu.concatenate %98, %98 in 1 : vector<1x128xf32>, vector<1x128xf32> -> vector<1x256xf32>
    %100 = vector.broadcast %99 : vector<1x256xf32> to vector<16x256xf32>
    %101 = arith.mulf %85, %100 : vector<16x256xf32>
    %c0_65 = arith.constant 0 : index
    %c2_66 = arith.constant 2 : index
    %c0_67 = arith.constant 0 : index
    %102 = vector.load %arg6[%c0_65, %c2_66, %c0_67] : memref<1x4x128xf32, #tpu.memory_space<vmem>>, vector<1x1x128xf32>
    %103 = vector.shape_cast %102 : vector<1x1x128xf32> to vector<1x128xf32>
    %c0_68 = arith.constant 0 : index
    %c3_69 = arith.constant 3 : index
    %c0_70 = arith.constant 0 : index
    %104 = vector.load %arg6[%c0_68, %c3_69, %c0_70] : memref<1x4x128xf32, #tpu.memory_space<vmem>>, vector<1x1x128xf32>
    %105 = vector.shape_cast %104 : vector<1x1x128xf32> to vector<1x128xf32>
    %106 = tpu.concatenate %105, %105 in 1 : vector<1x128xf32>, vector<1x128xf32> -> vector<1x256xf32>
    %107 = vector.broadcast %106 : vector<1x256xf32> to vector<16x256xf32>
    %108 = arith.mulf %101, %107 : vector<16x256xf32>
    %109 = tpu.concatenate %103, %103 in 1 : vector<1x128xf32>, vector<1x128xf32> -> vector<1x256xf32>
    %110 = vector.broadcast %109 : vector<1x256xf32> to vector<16x256xf32>
    %111 = arith.addf %108, %110 : vector<16x256xf32>
    %cst_71 = arith.constant 0.000000e+00 : f32
    %112 = vector.broadcast %cst_71 : f32 to vector<16x256xf32>
    %113 = arith.cmpf oge, %111, %112 : vector<16x256xf32>
    %cst_72 = arith.constant 0.000000e+00 : f32
    %114 = vector.broadcast %cst_72 : f32 to vector<16x256xf32>
    %115 = arith.mulf %114, %111 : vector<16x256xf32>
    %116 = arith.select %113, %111, %115 : vector<16x256xi1>, vector<16x256xf32>
    %117 = arith.extf %1 : vector<16x128xbf16> to vector<16x128xf32>
    %118 = tpu.concatenate %117, %117 in 1 : vector<16x128xf32>, vector<16x128xf32> -> vector<16x256xf32>
    %119 = arith.addf %116, %118 : vector<16x256xf32>
    %120 = arith.truncf %119 : vector<16x256xf32> to vector<16x256xbf16>
    %c0_73 = arith.constant 0 : index
    %c0_74 = arith.constant 0 : index
    %c0_75 = arith.constant 0 : index
    %121 = vector.load %arg7[%c0_73, %c0_74, %c0_75] : memref<1x16x256xbf16, #tpu.memory_space<vmem>>, vector<1x16x256xbf16>
    %122 = vector.shape_cast %121 : vector<1x16x256xbf16> to vector<16x256xbf16>
    %123 = vector.shape_cast %120 : vector<16x256xbf16> to vector<1x16x256xbf16>
    tpu.vector_store %arg7[%c0_73, %c0_74, %c0_75], %123 {strides = array<i32>} : memref<1x16x256xbf16, #tpu.memory_space<vmem>>, vector<1x16x256xbf16>,
    return
  }
  func.func @transform_0(%arg0: i32) -> (i32, i32, i32) {
    %c0_i32 = arith.constant 0 : i32
    %c0_i32_0 = arith.constant 0 : i32
    %c0_i32_1 = arith.constant 0 : i32
    return %arg0, %c0_i32, %c0_i32_0 : i32, i32, i32
  }
  func.func @transform_1(%arg0: i32) -> (i32, i32) {
    %c0_i32 = arith.constant 0 : i32
    %c0_i32_0 = arith.constant 0 : i32
    %c0_i32_1 = arith.constant 0 : i32
    return %c0_i32, %c0_i32_0 : i32, i32
  }
  func.func @transform_2(%arg0: i32) -> (i32, i32) {
    %c0_i32 = arith.constant 0 : i32
    %c0_i32_0 = arith.constant 0 : i32
    %c0_i32_1 = arith.constant 0 : i32
    return %c0_i32, %c0_i32_0 : i32, i32
  }
  func.func @transform_3(%arg0: i32) -> (i32, i32) {
    %c0_i32 = arith.constant 0 : i32
    %c0_i32_0 = arith.constant 0 : i32
    %c0_i32_1 = arith.constant 0 : i32
    return %c0_i32, %c0_i32_0 : i32, i32
  }
  func.func @transform_4(%arg0: i32) -> (i32, i32) {
    %c0_i32 = arith.constant 0 : i32
    %c0_i32_0 = arith.constant 0 : i32
    %c0_i32_1 = arith.constant 0 : i32
    return %c0_i32, %c0_i32_0 : i32, i32
  }
  func.func @transform_5(%arg0: i32) -> (i32, i32, i32) {
    %c0_i32 = arith.constant 0 : i32
    %c0_i32_0 = arith.constant 0 : i32
    %c0_i32_1 = arith.constant 0 : i32
    return %arg0, %c0_i32, %c0_i32_0 : i32, i32, i32
  }
  func.func @transform_6(%arg0: i32) -> (i32, i32, i32) {
    %c0_i32 = arith.constant 0 : i32
    %c0_i32_0 = arith.constant 0 : i32
    %c0_i32_1 = arith.constant 0 : i32
    return %arg0, %c0_i32, %c0_i32_0 : i32, i32, i32
  }
}

</mosaic_0001>

<bundles_post_ra>
// kernel: decoder_forward.7
= control target key start
LH: loop header
LB: loop body
LE: loop exit
PB: predicated region body
PF: predicated region fallthrough
CT: control target
= control target key end

     0   :  { %s467_s12 = smov 0   ;;  %s515_s0 = inlined_call_operand.vmem [shape: bf16[2,32,128], index: 0, kind: input, shape index: {}]   ;;  %s516_s1 = inlined_call_operand.vmem [shape: bf16[128,128], index: 1, kind: input, shape index: {}]   ;;  %s517_s2 = inlined_call_operand.vmem [shape: f32[1,128], index: 2, kind: input, shape index: {}]   ;;  %s518_s3 = inlined_call_operand.vmem [shape: f32[2,32,128], index: 3, kind: output, shape index: {}]  }
   0x1 LB: > { %s367_s13 = sadd.s32 4294967295, %s445_s12   ;;  %p371_p0 = scmp.ge.s32.totalorder %s445_s12, 1  ;;  %s445_s12 = sphi %s467_s12, %s13_s12  }
   0x2   : > { %p137_p1 = scmp.lt.s32.totalorder %s445_s12, 3 }
   0x4   : > { %p138_p2 = pnand %p371_p0, %p137_p1 }
   0x5   : > { %p161_p3 = scmp.lt.s32.totalorder (!%p138_p2), %s367_s13, 1 }
   0x6   : > { %141 = sbr.rel (%p138_p2) target bundleno = 246 (0xf6), region = 32 }
   0xb   : > { %v429_v0 = vld [vmem:[%s516_s1 + $0x38] sm:$0xff]   ;;  %v430_v1 = vld [vmem:[%s516_s1 + $0x30] sm:$0xff]   ;;  %s520_s13 = smov (!%p161_p3, %s367_s13), 1  ;;  %v431_v2 = vld [vmem:[%s516_s1 + $0x28] sm:$0xff]  }
   0xc   : > { %401 = vmatprep.subr.bf16.mxu0 %v429_v0  ;;  %s389_s20 = sshll.u32 %s520_s13, 4  ;;  %v432_v3 = vld [vmem:[%s516_s1 + $0x20] sm:$0xff]   ;;  %v433_v5 = vld [vmem:[%s516_s1 + $0x18] sm:$0xff]   ;;  %v434_v6 = vld [vmem:[%s516_s1 + $0x10] sm:$0xff]   ;;  %s390_s7 = sshll.u32 %s520_s13, 5 }
   0xd   : > { %402 = vmatpush3.bf16.msra.mxu0 %v429_v0  ;;  %s165_s23 = scalar_lea.vmem %s515_s0, %s389_s20  ;;  %v435_v7 = vld [vmem:[%s516_s1 + $0x8] sm:$0xff]   ;;  %v436_v8 = vld [vmem:[%s516_s1] sm:$0xff]   ;;  %s170_s14 = scalar_lea.vmem %s518_s3, %s390_s7 }
   0xe   : > { %403 = vmatprep.subr.bf16.mxu0 %v430_v1  ;;  %v437_v4 = vld [vmem:[%s165_s23] sm:$0xff]   ;;  %v438_v9 = vld [vmem:[%s165_s23 + $0x8] sm:$0xff]  }
   0xf   : > { %417 = vmatprep.mubr.bf16.mxu0 %v437_v4  ;;  %v376_v10 = vld [vmem:[%s517_s2] ss:$0 sm:$0xff] }
  0x11   : > { %404 = vmatpush3.bf16.msra.mxu0 %v430_v1 }
  0x12   : > { %405 = vmatprep.subr.bf16.mxu0 %v431_v2 }
  0x15   : > { %406 = vmatpush3.bf16.msra.mxu0 %v431_v2 }
  0x16   : > { %407 = vmatprep.subr.bf16.mxu0 %v432_v3 }
  0x19   : > { %408 = vmatpush3.bf16.msra.mxu0 %v432_v3 }
  0x1a   : > { %409 = vmatprep.subr.bf16.mxu0 %v433_v5 }
  0x1d   : > { %410 = vmatpush3.bf16.msra.mxu0 %v433_v5 }
  0x1e   : > { %411 = vmatprep.subr.bf16.mxu0 %v434_v6 }
  0x21   : > { %412 = vmatpush3.bf16.msra.mxu0 %v434_v6 }
  0x22   : > { %413 = vmatprep.subr.bf16.mxu0 %v435_v7 }
  0x25   : > { %414 = vmatpush3.bf16.msra.mxu0 %v435_v7 }
  0x26   : > { %415 = vmatprep.subr.bf16.mxu0 %v436_v8 }
  0x29   : > { %416 = vmatpush3.bf16.msra.mxu0 %v436_v8 }
  0x2c   : > { %418 = vmatmul.mubr.bf16.vlgmr.msra.gmra.mxu0 %v438_v9 }
  0xec   : > { %v419_v11 = vpop.f32.mrf.mxu0 }
  0xed   : > { %v302_v12 = vadd.f32 %v419_v11, %v376_v10 }
  0xee   : > { %v293_v13 = vpop.f32.mrf.mxu0 }
  0xef   : > { %310 = vst [vmem:[%s170_s14 + $0x10] sm:$0xff] %v302_v12  ;;  %v294_v14 = vadd.f32 %v376_v10, %v293_v13 }
  0xf0   : > { %v420_v15 = vpop.f32.mrf.mxu0 }
  0xf1   : > { %308 = vst [vmem:[%s170_s14] sm:$0xff] %v294_v14  ;;  %v305_v16 = vadd.f32 %v420_v15, %v376_v10 }
  0xf2   : > { %v296_v17 = vpop.f32.mrf.mxu0 }
  0xf3   : > { %311 = vst [vmem:[%s170_s14 + $0x18] sm:$0xff] %v305_v16  ;;  %v297_v18 = vadd.f32 %v376_v10, %v296_v17 }
  0xf5   : > { %309 = vst [vmem:[%s170_s14 + $0x8] sm:$0xff] %v297_v18 }
  0xf6 PF: > { %s13_s12 = sadd.s32 1, %s445_s12  }
  0xf7   : > { %p10_p4 = scmp.ge.s32.totalorder %s13_s12, 4  }
  0xf9   :  { %12 = sbr.rel (!%p10_p4) target bundleno = 1 (0x1), region = 62 }

// kernel: decoder_forward.4
= control target key start
LH: loop header
LB: loop body
LE: loop exit
PB: predicated region body
PF: predicated region fallthrough
CT: control target
= control target key end

     0   :  { %8 = vsyncpa [#allocation3], 0  ;;  %s575_s12 = smov 0   ;;  %s624_s0 = inlined_call_operand.vmem [shape: bf16[2,16,128], index: 0, kind: input, shape index: {}]   ;;  %s625_s1 = inlined_call_operand.hbm [shape: bf16[128,128], index: 1, kind: input, shape index: {}]   ;;  %s626_s2 = inlined_call_operand.vmem [shape: f32[1,128], index: 2, kind: input, shape index: {}]   ;;  %s627_s3 = inlined_call_operand.vmem [shape: bf16[2,16,128], index: 3, kind: output, shape index: {}]  }
   0x1 LB: > { %s581_s13 = sadd.s32 4294967295, %s548_s12   ;;  %p417_p0 = scmp.ge.s32.totalorder %s548_s12, 1  ;;  %s548_s12 = sphi %s575_s12, %s14_s12  }
   0x2   : > { %p113_p1 = scmp.lt.s32.totalorder %s548_s12, 3  ;;  %s550_s14 = smov [#allocation2]  }
   0x3   : > { %s125_s15 = sshll.u32 %s550_s14, 4  ;;  %p486_p3 = scmp.eq.s32.totalorder %s581_s13, 0  ;;  %s126_s15 = int_to_ptr.vmem [resolvable:$true] %s125_s15 }
   0x4   : > { %p585_p2 = pnand %p417_p0, %p113_p1  ;;  %s523_s17 = scalar_lea.vmem %s126_s15, 1024 }
   0x5   : > { %p524_p7 = scmp.ne.s32.totalorder %s126_s15, %s523_s17  ;;  %p531_p10 = scmp.lt.s32.totalorder %s126_s15, %s126_s15 }
   0x6   : > { %p482_p4 = pneg %p585_p2  ;;  %p532_p11 = scmp.lt.s32.totalorder %s523_s17, %s523_s17 }
   0x8   : > { %p483_p5 = pnand %p486_p3, %p482_p4  ;;  %p533_p12 = por %p532_p11, %p531_p10 }
   0xa   : > { %p514_p6 = pneg %p483_p5 }
   0xc   : > { %p526_p8 = pnand %p524_p7, %p514_p6 }
   0xe   : > { %p527_p9 = pneg %p526_p8 }
  0x10   : > { %p534_p13 = pnand %p533_p12, %p527_p9 }
  0x12   : > { %537 = shalt.err (!%p534_p13)
}
  0x13   : > { %s551_s18 = smov 64   ;;  %s552_s19 = smov 4  }
  0x14   : > { %485 = dma.hbm_to_vmem [thread:$0]  (!%p483_p5), %s625_s1, 1024, %s126_s15, [#allocation3], %s551_s18, %s551_s18, %s552_s19  }
  0x15   : > { %152 = sbr.rel (%p585_p2) target bundleno = 319 (0x13f), region = 32 }
  0x1a   : > { %543 = dma.done.wait (%p486_p3), [#allocation3], 1024  }
  0x1b   : > { %545 = vsyncadd (%p486_p3), [#allocation3], 4294966272  ;;  %v553_v0 = vmov 0.0   ;;  %vm554_vm0 = vmmov 0   ;;  %p176_p0 = scmp.lt.s32.totalorder %s581_s13, 1  ;;  %v501_v1 = vld [vmem:[#allocation2 + $0x38] sm:$0xff]  }
  0x1c   : > { %458 = vmatprep.subr.bf16.mxu0 %v553_v0  ;;  %474 = vmatprep.mubr.msk.bf16.mxu0 %vm554_vm0, %v553_v0  ;;  %v502_v2 = vld [vmem:[#allocation2 + $0x30] sm:$0xff]   ;;  %v503_v3 = vld [vmem:[#allocation2 + $0x28] sm:$0xff]   ;;  %v504_v4 = vld [vmem:[#allocation2 + $0x20] sm:$0xff]  }
  0x1d   : > { %s630_s13 = smov (!%p176_p0, %s581_s13), 1  ;;  %459 = vmatpush3.bf16.msra.mxu0 %v501_v1  ;;  %v505_v5 = vld [vmem:[#allocation2 + $0x18] sm:$0xff]   ;;  %v506_v6 = vld [vmem:[#allocation2 + $0x10] sm:$0xff]   ;;  %v507_v7 = vld [vmem:[#allocation2 + $0x8] sm:$0xff]  }
  0x1e   : > { %460 = vmatprep.subr.bf16.mxu0 %v553_v0  ;;  %s440_s22 = sshll.u32 %s630_s13, 3  ;;  %v508_v8 = vld [vmem:[#allocation2] sm:$0xff]   ;;  %v426_v11 = vld [vmem:[%s626_s2] ss:$0 sm:$0xff] }
  0x1f   : > { %s180_s25 = scalar_lea.vmem %s624_s0, %s440_s22  ;;  %s185_s30 = scalar_lea.vmem %s627_s3, %s440_s22 }
  0x20   : > { %v509_v9 = vld [vmem:[%s180_s25] sm:$0xff]  }
  0x21   : > { %461 = vmatpush3.bf16.msra.mxu0 %v502_v2 }
  0x22   : > { %462 = vmatprep.subr.bf16.mxu0 %v553_v0 }
  0x25   : > { %463 = vmatpush3.bf16.msra.mxu0 %v503_v3 }
  0x26   : > { %464 = vmatprep.subr.bf16.mxu0 %v553_v0 }
  0x29   : > { %465 = vmatpush3.bf16.msra.mxu0 %v504_v4 }
  0x2a   : > { %466 = vmatprep.subr.bf16.mxu0 %v553_v0 }
  0x2d   : > { %467 = vmatpush3.bf16.msra.mxu0 %v505_v5 }
  0x2e   : > { %468 = vmatprep.subr.bf16.mxu0 %v553_v0 }
  0x31   : > { %469 = vmatpush3.bf16.msra.mxu0 %v506_v6 }
  0x32   : > { %470 = vmatprep.subr.bf16.mxu0 %v553_v0 }
  0x35   : > { %471 = vmatpush3.bf16.msra.mxu0 %v507_v7 }
  0x36   : > { %472 = vmatprep.subr.bf16.mxu0 %v553_v0 }
  0x39   : > { %473 = vmatpush3.bf16.msra.mxu0 %v508_v8 }
  0x3c   : > { %475 = vmatmul.mubr.bf16.vlgmr.msra.gmra.mxu0 %v509_v9 }
  0xfc   : > { %v300_v10 = vpop.f32.mrf.mxu0 }
  0xfd   : > { %v301_v14 = vadd.f32 %v426_v11, %v300_v10 }
  0xfe   : > { %v476_v12 = vpop.f32.mrf.mxu0 }
 0x100   : > { %v303_v13 = vpop.f32.mrf.mxu0 }
 0x101   : > { %v304_v15 = vadd.f32 %v426_v11, %v303_v13 }
 0x102   : > { %v477_v16 = vpop.f32.mrf.mxu0 }
 0x103   : > { %v307_v17 = vadd.f32 %v304_v15, %v301_v14 }
 0x105   : > { %v308_v18 = vrot.slane %v307_v17, 4 }
 0x107   : > { %v309_v19 = vadd.f32 %v308_v18, %v307_v17 }
 0x109   : > { %v310_v20 = vrot.slane %v309_v19, 2 }
 0x10b   : > { %v311_v21 = vadd.f32 %v310_v20, %v309_v19 }
 0x10d   : > { %v312_v22 = vrot.slane %v311_v21, 1 }
 0x10f   : > { %v313_v23 = vadd.f32 %v312_v22, %v311_v21 }
 0x111   : > { %v315_v24 = vmul.f32 0.0625, %v313_v23 }
 0x113   : > { %v316_v25 = vsub.f32 %v301_v14, %v315_v24  ;;  %v317_v26 = vsub.f32 %v304_v15, %v315_v24 }
 0x115   : > { %v318_v27 = vmul.f32 %v316_v25, %v316_v25  ;;  %v319_v28 = vmul.f32 %v317_v26, %v317_v26 }
 0x117   : > { %v320_v29 = vadd.f32 %v319_v28, %v318_v27 }
 0x119   : > { %v321_v30 = vrot.slane %v320_v29, 4 }
 0x11b   : > { %v322_v31 = vadd.f32 %v321_v30, %v320_v29 }
 0x11d   : > { %v323_v32 = vrot.slane %v322_v31, 2 }
 0x11f   : > { %v324_v33 = vadd.f32 %v323_v32, %v322_v31 }
 0x121   : > { %v325_v34 = vrot.slane %v324_v33, 1 }
 0x123   : > { %v326_v35 = vadd.f32 %v325_v34, %v324_v33 }
 0x125   : > { %v327_v36 = vmul.f32 0.0625, %v326_v35 }
 0x127   : > { %v328_v37 = vadd.f32 1e-05, %v327_v36 }
 0x129   : > { %510 = vrsqrt.f32 %v328_v37 }
 0x136   : > { %v511_v38 = vpop.eup %510 }
 0x137   : > { %v330_v39 = vmul.f32 %v511_v38, %v316_v25  ;;  %v331_v40 = vmul.f32 %v511_v38, %v317_v26 }
 0x139   : > { %vm332_vm1 = vcmp.ge.f32.partialorder %v330_v39, 0.0  ;;  %vm333_vm2 = vcmp.ge.f32.partialorder %v331_v40, 0.0  ;;  %v334_v41 = vmul.f32 0.0, %v330_v39  ;;  %v335_v42 = vmul.f32 0.0, %v331_v40 }
 0x13b   : > { %v336_v43 = vsel %vm332_vm1, %v330_v39, %v334_v41  ;;  %v337_v44 = vsel %vm333_vm2, %v331_v40, %v335_v42 }
 0x13c   : > { %v447_v45 = vpack.c.bf16 %v337_v44, %v336_v43 }
 0x13e   : > { %448 = vst [vmem:[%s185_s30] sm:$0xff] %v447_v45  }
 0x13f PF: > { %s14_s12 = sadd.s32 1, %s548_s12  }
 0x140   : > { %p11_p1 = scmp.ge.s32.totalorder %s14_s12, 4  }
 0x142   :  { %13 = sbr.rel (!%p11_p1) target bundleno = 1 (0x1), region = 67 }
 0x147   :  { %369 = vsyncpa [#allocation3], 1 }
 0x148   :  { %371 = vsyncpa [#allocation3 + $0x1], 1 }

// kernel: decoder_forward.6
= control target key start
LH: loop header
LB: loop body
LE: loop exit
PB: predicated region body
PF: predicated region fallthrough
CT: control target
= control target key end

     0   :  { %s1959_s21 = smov 0   ;;  %s2281_s0 = inlined_call_operand.vmem [shape: bf16[2,32,128], index: 0, kind: input, shape index: {}]   ;;  %s2282_s1 = inlined_call_operand.vmem [shape: bf16[640,128], index: 1, kind: input, shape index: {}]   ;;  %s2283_s2 = inlined_call_operand.vmem [shape: f32[1,128], index: 2, kind: input, shape index: {}]   ;;  %s2284_s3 = inlined_call_operand.vmem [shape: bf16[640,128], index: 3, kind: input, shape index: {}]   ;;  %s2285_s4 = inlined_call_operand.vmem [shape: f32[1,128], index: 4, kind: input, shape index: {}]   ;;  %s2286_s5 = inlined_call_operand.vmem [shape: f32[2,4,128], index: 5, kind: input, shape index: {}]   ;;  %s2287_s6 = inlined_call_operand.vmem [shape: bf16[2,32,128], index: 6, kind: output, shape index: {}]  }
   0x1 LB: > { %s1522_s22 = sadd.s32 4294967295, %s1922_s21   ;;  %p1526_p0 = scmp.ge.s32.totalorder %s1922_s21, 1  ;;  %s1922_s21 = sphi %s1959_s21, %s16_s21  }
   0x2   : > { %p221_p1 = scmp.lt.s32.totalorder %s1922_s21, 3 }
   0x4   : > { %p222_p2 = pnand %p1526_p0, %p221_p1 }
   0x5   : > { %p255_p3 = scmp.lt.s32.totalorder (!%p222_p2), %s1522_s22, 1 }
   0x6   : > { %225 = sbr.rel (%p222_p2) target bundleno = 669 (0x29d), region = 44 }
   0xb   : > { %v1830_v0 = vld [vmem:[%s2282_s1 + $0x78] sm:$0xff]   ;;  %v1834_v4 = vld [vmem:[%s2282_s1 + $0x70] sm:$0xff]   ;;  %v1838_v8 = vld [vmem:[%s2282_s1 + $0x68] sm:$0xff]   ;;  %s2289_s22 = smov (!%p255_p3, %s1522_s22), 1 }
   0xc   : > { %v1831_v1 = vld [vmem:[%s2282_s1 + $0x38] sm:$0xff]   ;;  %1650 = vmatprep.subr.bf16.mxu0 %v1830_v0  ;;  %v1835_v5 = vld [vmem:[%s2282_s1 + $0x30] sm:$0xff]   ;;  %v1839_v9 = vld [vmem:[%s2282_s1 + $0x28] sm:$0xff]   ;;  %s1624_s7 = sshll.u32 %s2289_s22, 4  ;;  %s1529_s25 = sshll.u32 %s2289_s22, 2 }
   0xd   : > { %v1832_v2 = vld [vmem:[%s2282_s1 + $0xf8] sm:$0xff]   ;;  %1651 = vmatpush3.bf16.msra.mxu0 %v1831_v1  ;;  %v1836_v6 = vld [vmem:[%s2282_s1 + $0xf0] sm:$0xff]   ;;  %v1840_v10 = vld [vmem:[%s2282_s1 + $0xe8] sm:$0xff]   ;;  %s2066_s16 = scalar_lea.vmem %s2281_s0, %s1624_s7  ;;  %s2236_s28 = scalar_lea.vmem %s2286_s5, %s1529_s25 }
   0xe   : > { %v1833_v3 = vld [vmem:[%s2282_s1 + $0xb8] sm:$0xff]   ;;  %1678 = vmatprep.subr.bf16.mxu1 %v1832_v2  ;;  %1652 = vmatprep.subr.bf16.mxu0 %v1834_v4  ;;  %v1837_v7 = vld [vmem:[%s2282_s1 + $0xb0] sm:$0xff]   ;;  %v1841_v11 = vld [vmem:[%s2282_s1 + $0xa8] sm:$0xff]   ;;  %s268_s26 = scalar_lea.vmem %s2287_s6, %s1624_s7 }
   0xf   : > { %1679 = vmatpush3.bf16.msra.mxu1 %v1833_v3  ;;  %v1842_v12 = vld [vmem:[%s2282_s1 + $0x60] sm:$0xff]   ;;  %v1846_v16 = vld [vmem:[%s2282_s1 + $0x58] sm:$0xff]   ;;  %v1850_v20 = vld [vmem:[%s2282_s1 + $0x50] sm:$0xff]  }
  0x10   : > { %1680 = vmatprep.subr.bf16.mxu1 %v1836_v6  ;;  %v1843_v13 = vld [vmem:[%s2282_s1 + $0x20] sm:$0xff]   ;;  %v1847_v17 = vld [vmem:[%s2282_s1 + $0x18] sm:$0xff]   ;;  %v1851_v21 = vld [vmem:[%s2282_s1 + $0x10] sm:$0xff]  }
  0x11   : > { %1653 = vmatpush3.bf16.msra.mxu0 %v1835_v5  ;;  %v1844_v14 = vld [vmem:[%s2282_s1 + $0xe0] sm:$0xff]   ;;  %v1848_v18 = vld [vmem:[%s2282_s1 + $0xd8] sm:$0xff]   ;;  %v1852_v22 = vld [vmem:[%s2282_s1 + $0xd0] sm:$0xff]  }
  0x12   : > { %1654 = vmatprep.subr.bf16.mxu0 %v1838_v8  ;;  %v1845_v15 = vld [vmem:[%s2282_s1 + $0xa0] sm:$0xff]   ;;  %v1849_v19 = vld [vmem:[%s2282_s1 + $0x98] sm:$0xff]   ;;  %v1853_v23 = vld [vmem:[%s2282_s1 + $0x90] sm:$0xff]  }
  0x13   : > { %1681 = vmatpush3.bf16.msra.mxu1 %v1837_v7  ;;  %v1854_v24 = vld [vmem:[%s2282_s1 + $0x48] sm:$0xff]   ;;  %v1858_v28 = vld [vmem:[%s2282_s1 + $0x40] sm:$0xff]   ;;  %v1862_v35 = vld [vmem:[%s2282_s1 + $0x138] sm:$0xff]  }
  0x14   : > { %1682 = vmatprep.subr.bf16.mxu1 %v1840_v10  ;;  %v1855_v25 = vld [vmem:[%s2282_s1 + $0x8] sm:$0xff]   ;;  %v1859_v29 = vld [vmem:[%s2282_s1] sm:$0xff]   ;;  %v1864_v46 = vld [vmem:[%s2282_s1 + $0x130] sm:$0xff]  }
  0x15   : > { %1655 = vmatpush3.bf16.msra.mxu0 %v1839_v9  ;;  %v1856_v26 = vld [vmem:[%s2282_s1 + $0xc8] sm:$0xff]   ;;  %v1860_v30 = vld [vmem:[%s2282_s1 + $0xc0] sm:$0xff]   ;;  %v1867_v1 = vld [vmem:[%s2282_s1 + $0x118] sm:$0xff]  }
  0x16   : > { %1656 = vmatprep.subr.bf16.mxu0 %v1842_v12  ;;  %v1857_v27 = vld [vmem:[%s2282_s1 + $0x88] sm:$0xff]   ;;  %v2075_v31 = vld [vmem:[%s2066_s16] sm:$0xff]   ;;  %v1869_v2 = vld [vmem:[%s2282_s1 + $0x110] sm:$0xff]  }
  0x17   : > { %1683 = vmatpush3.bf16.msra.mxu1 %v1841_v11  ;;  %v2078_v32 = vunpack.c.l.bf16 %v2075_v31  ;;  %v1633_v33 = vunpack.c.h.bf16 %v2075_v31  ;;  %v1861_v34 = vld [vmem:[%s2282_s1 + $0x80] sm:$0xff]   ;;  %v2088_v36 = vld [vmem:[%s2066_s16 + $0x8] sm:$0xff]   ;;  %v1872_v8 = vld [vmem:[%s2284_s3 + $0x78] sm:$0xff]  }
  0x18   : > { %1684 = vmatprep.subr.bf16.mxu1 %v1844_v14  ;;  %v1636_v37 = vunpack.c.l.bf16 %v2088_v36  ;;  %v2097_v38 = vunpack.c.h.bf16 %v2088_v36  ;;  %v1863_v42 = vld [vmem:[%s2066_s16] sm:$0xff]  ;;  %v1865_v54 = vld [vmem:[%s2282_s1 + $0x128] sm:$0xff]   ;;  %v1873_v9 = vld [vmem:[%s2284_s3 + $0x38] sm:$0xff]  }
  0x19   : > { %1657 = vmatpush3.bf16.msra.mxu0 %v1843_v13  ;;  %278 = vst [vmem:[#allocation2 + $0x2] sm:$0xff] %v2078_v32  ;;  %279 = vst [vmem:[#allocation2 + $0xa] sm:$0xff] %v1633_v33  ;;  %v1866_v61 = vld [vmem:[%s2282_s1 + $0x120] sm:$0xff]   ;;  %v1868_v63 = vld [vmem:[%s2066_s16 + $0x8] sm:$0xff] }
  0x1a   : > { %1658 = vmatprep.subr.bf16.mxu0 %v1846_v16  ;;  %283 = vst [vmem:[#allocation2] sm:$0x2] %v2078_v32  ;;  %282 = vst [vmem:[#allocation2 - $0x2] sm:$0x4] %v2078_v32  ;;  %v1870_v3 = vld [vmem:[%s2282_s1 + $0x108] sm:$0xff]   ;;  %v1871_v4 = vld [vmem:[%s2282_s1 + $0x100] sm:$0xff]  }
  0x1b   : > { %1685 = vmatpush3.bf16.msra.mxu1 %v1845_v15  ;;  %280 = vst [vmem:[#allocation2 + $0x12] sm:$0xff] %v1636_v37  ;;  %285 = vst [vmem:[#allocation2 + $0x1e] sm:$0x20] %v2097_v38  ;;  %v1874_v10 = vld [vmem:[%s2284_s3 + $0xf8] sm:$0xff]   ;;  %v1876_v12 = vld [vmem:[%s2284_s3 + $0x70] sm:$0xff]  }
  0x1c   : > { %1686 = vmatprep.subr.bf16.mxu1 %v1848_v18  ;;  %281 = vst [vmem:[#allocation2 + $0x1a] sm:$0xff] %v2097_v38  ;;  %284 = vst [vmem:[#allocation2 + $0x1c] sm:$0x40] %v2097_v38  ;;  %v1875_v11 = vld [vmem:[%s2284_s3 + $0xb8] sm:$0xff]   ;;  %v1877_v13 = vld [vmem:[%s2284_s3 + $0x30] sm:$0xff]  }
  0x1d   : > { %1659 = vmatpush3.bf16.msra.mxu0 %v1847_v17  ;;  %v1878_v14 = vld [vmem:[%s2284_s3 + $0xf0] sm:$0xff]   ;;  %v1880_v16 = vld [vmem:[%s2284_s3 + $0x68] sm:$0xff]  }
  0x1e   : > { %1660 = vmatprep.subr.bf16.mxu0 %v1850_v20  ;;  %v1879_v15 = vld [vmem:[%s2284_s3 + $0xb0] sm:$0xff]   ;;  %v1881_v17 = vld [vmem:[%s2284_s3 + $0x28] sm:$0xff]   ;;  %v1884_v20 = vld [vmem:[%s2284_s3 + $0x60] sm:$0xff]  }
  0x1f   : > { %1687 = vmatpush3.bf16.msra.mxu1 %v1849_v19  ;;  %v1882_v18 = vld [vmem:[%s2284_s3 + $0xe8] sm:$0xff]  }
  0x20   : > { %1688 = vmatprep.subr.bf16.mxu1 %v1852_v22  ;;  %v291_v40 = vld [vmem:[#allocation2 + $0x9] sm:$0xff]  ;;  %v1883_v19 = vld [vmem:[%s2284_s3 + $0xa8] sm:$0xff]  }
  0x21   : > { %1661 = vmatpush3.bf16.msra.mxu0 %v1851_v21  ;;  %v290_v39 = vld [vmem:[#allocation2 + $0x1] sm:$0xff]  ;;  %v1885_v21 = vld [vmem:[%s2284_s3 + $0x20] sm:$0xff]  }
  0x22   : > { %1662 = vmatprep.subr.bf16.mxu0 %v1854_v24  ;;  %v286_v41 = vld [vmem:[#allocation2] sm:$0xff]  ;;  %v307_v43 = vpack.c.bf16 %v291_v40, %v290_v39  ;;  %v287_v44 = vld [vmem:[#allocation2 + $0x8] sm:$0xff]  ;;  %v292_v49 = vld [vmem:[#allocation2 + $0x11] sm:$0xff] }
  0x23   : > { %1689 = vmatpush3.bf16.msra.mxu1 %v1853_v23  ;;  %v298_v45 = vld [vmem:[#allocation2 + $0x3] sm:$0xff]  ;;  %v306_v47 = vpack.c.bf16 %v287_v44, %v286_v41  ;;  %v299_v48 = vld [vmem:[#allocation2 + $0xb] sm:$0xff]  ;;  %v293_v50 = vld [vmem:[#allocation2 + $0x19] sm:$0xff] }
  0x24   : > { %1690 = vmatprep.subr.bf16.mxu1 %v1856_v26  ;;  %675 = vmatprep.mubr.bf16.mxu0 %v307_v43  ;;  %v309_v51 = vpack.c.bf16 %v299_v48, %v298_v45  ;;  %v312_v52 = vpack.c.bf16 %v293_v50, %v292_v49  ;;  %v300_v53 = vld [vmem:[#allocation2 + $0x13] sm:$0xff]  ;;  %v301_v57 = vld [vmem:[#allocation2 + $0x1b] sm:$0xff]  ;;  %v302_v59 = vld [vmem:[#allocation2 + $0x4] sm:$0xff] }
  0x25   : > { %1663 = vmatpush3.bf16.msra.mxu0 %v1855_v25  ;;  %v288_v55 = vld [vmem:[#allocation2 + $0x10] sm:$0xff]  ;;  %v289_v56 = vld [vmem:[#allocation2 + $0x18] sm:$0xff]  ;;  %v314_v58 = vpack.c.bf16 %v301_v57, %v300_v53  ;;  %v1888_v24 = vld [vmem:[%s2284_s3 + $0x58] sm:$0xff]  }
  0x26   : > { %1664 = vmatprep.subr.bf16.mxu0 %v1858_v28  ;;  %724 = vmatprep.mubr.bf16.mxu1 %v309_v51  ;;  %v303_v60 = vld [vmem:[#allocation2 + $0xc] sm:$0xff]  ;;  %v311_v62 = vpack.c.bf16 %v289_v56, %v288_v55  ;;  %v304_v5 = vld [vmem:[#allocation2 + $0x14] sm:$0xff]  ;;  %v305_v6 = vld [vmem:[#allocation2 + $0x1c] sm:$0xff] }
  0x27   : > { %1691 = vmatpush3.bf16.msra.mxu1 %v1857_v27  ;;  %v310_v0 = vpack.c.bf16 %v303_v60, %v302_v59  ;;  %v315_v7 = vpack.c.bf16 %v305_v6, %v304_v5  ;;  %v1886_v22 = vld [vmem:[%s2284_s3 + $0xe0] sm:$0xff]   ;;  %v1889_v25 = vld [vmem:[%s2284_s3 + $0x18] sm:$0xff]   ;;  %v1892_v28 = vld [vmem:[%s2284_s3 + $0x50] sm:$0xff]  }
  0x28   : > { %1692 = vmatprep.subr.bf16.mxu1 %v1860_v30  ;;  %v1887_v23 = vld [vmem:[%s2284_s3 + $0xa0] sm:$0xff]   ;;  %v1890_v26 = vld [vmem:[%s2284_s3 + $0xd8] sm:$0xff]   ;;  %v1894_v30 = vld [vmem:[%s2284_s3 + $0xd0] sm:$0xff]  }
  0x29   : > { %1665 = vmatpush3.bf16.msra.mxu0 %v1859_v29  ;;  %v1891_v27 = vld [vmem:[%s2284_s3 + $0x98] sm:$0xff]   ;;  %v1893_v29 = vld [vmem:[%s2284_s3 + $0x10] sm:$0xff]   ;;  %v1897_v39 = vld [vmem:[%s2284_s3 + $0x8] sm:$0xff]  }
  0x2a   : > { %1782 = vmatprep.subr.bf16.mxu0 %v1862_v35  ;;  %v1898_v40 = vld [vmem:[%s2284_s3 + $0xc8] sm:$0xff]   ;;  %v1902_v43 = vld [vmem:[%s2284_s3 + $0xc0] sm:$0xff]  }
  0x2b   : > { %1693 = vmatpush3.bf16.msra.mxu1 %v1861_v34  ;;  %v1895_v34 = vld [vmem:[%s2284_s3 + $0x90] sm:$0xff]   ;;  %v1899_v41 = vld [vmem:[%s2284_s3 + $0x88] sm:$0xff]   ;;  %v1901_v44 = vld [vmem:[%s2284_s3] sm:$0xff]  }
  0x2c   : > { %676 = vmatmul.mubr.bf16.vlgmr.msra.gmra.mxu0 %v306_v47  ;;  %1716 = vmatprep.subr.bf16.mxu1 %v1872_v8  ;;  %v1903_v45 = vld [vmem:[%s2284_s3 + $0x80] sm:$0xff]  }
  0x2d   : > { %1783 = vmatpush3.bf16.msra.mxu0 %v1862_v35  ;;  %683 = vmatprep.mubr.bf16.mxu0 %v312_v52  ;;  %v1896_v35 = vld [vmem:[%s2284_s3 + $0x48] sm:$0xff]  }
  0x2e   : > { %725 = vmatmul.mubr.bf16.vlgmr.msra.gmra.mxu1 %v1863_v42  ;;  %1784 = vmatprep.subr.bf16.mxu0 %v1864_v46  ;;  %v1900_v42 = vld [vmem:[%s2284_s3 + $0x40] sm:$0xff]  }
  0x2f   : > { %732 = vmatprep.mubr.bf16.mxu1 %v314_v58  ;;  %1717 = vmatpush3.bf16.msra.mxu1 %v1873_v9 }
  0x30   : > { %1718 = vmatprep.subr.bf16.mxu1 %v1876_v12 }
  0x31   : > { %1785 = vmatpush3.bf16.msra.mxu0 %v1864_v46  ;;  %v2226_v46 = vld [vmem:[%s2284_s3 + $0x138] sm:$0xff]  }
  0x32   : > { %1786 = vmatprep.subr.bf16.mxu0 %v1865_v54 }
  0x33   : > { %1719 = vmatpush3.bf16.msra.mxu1 %v1877_v13 }
  0x34   : > { %684 = vmatmul.mubr.bf16.gmra.mxu0 %v311_v62  ;;  %1720 = vmatprep.subr.bf16.mxu1 %v1880_v16 }
  0x35   : > { %1787 = vmatpush3.bf16.msra.mxu0 %v1865_v54  ;;  %1798 = vmatprep.mubr.bf16.mxu0 %v310_v0 }
  0x36   : > { %1788 = vmatprep.subr.bf16.mxu0 %v1866_v61  ;;  %733 = vmatmul.mubr.bf16.gmra.mxu1 %v1868_v63 }
  0x37   : > { %1721 = vmatpush3.bf16.msra.mxu1 %v1881_v17 }
  0x38   : > { %1722 = vmatprep.subr.bf16.mxu1 %v1884_v20 }
  0x39   : > { %1789 = vmatpush3.bf16.msra.mxu0 %v1866_v61  ;;  %v1532_v61 = vld [vmem:[%s2283_s2] ss:$0 sm:$0xff] }
  0x3a   : > { %1790 = vmatprep.subr.bf16.mxu0 %v1867_v1 }
  0x3b   : > { %1723 = vmatpush3.bf16.msra.mxu1 %v1885_v21 }
  0x3c   : > { %1724 = vmatprep.subr.bf16.mxu1 %v1888_v24 }
  0x3d   : > { %1791 = vmatpush3.bf16.msra.mxu0 %v1867_v1 }
  0x3e   : > { %1792 = vmatprep.subr.bf16.mxu0 %v1869_v2 }
  0x3f   : > { %1725 = vmatpush3.bf16.msra.mxu1 %v1889_v25 }
  0x40   : > { %1726 = vmatprep.subr.bf16.mxu1 %v1892_v28 }
  0x41   : > { %1793 = vmatpush3.bf16.msra.mxu0 %v1869_v2 }
  0x42   : > { %1794 = vmatprep.subr.bf16.mxu0 %v1870_v3 }
  0x43   : > { %1727 = vmatpush3.bf16.msra.mxu1 %v1893_v29 }
  0x44   : > { %1728 = vmatprep.subr.bf16.mxu1 %v1896_v35 }
  0x45   : > { %1795 = vmatpush3.bf16.msra.mxu0 %v1870_v3 }
  0x46   : > { %1796 = vmatprep.subr.bf16.mxu0 %v1871_v4 }
  0x47   : > { %1729 = vmatpush3.bf16.msra.mxu1 %v1897_v39 }
  0x48   : > { %1730 = vmatprep.subr.bf16.mxu1 %v1900_v42 }
  0x49   : > { %1797 = vmatpush3.bf16.msra.mxu0 %v1871_v4 }
  0x4a   : > { %1744 = vmatprep.subr.bf16.mxu0 %v1874_v10 }
  0x4b   : > { %1731 = vmatpush3.bf16.msra.mxu1 %v1901_v44 }
  0x4c   : > { %1799 = vmatmul.mubr.bf16.vlgmr.msra.gmra.mxu0 %v315_v7  ;;  %1802 = vmatprep.subr.bf16.mxu1 %v2226_v46 }
  0x4d   : > { %1745 = vmatpush3.bf16.msra.mxu0 %v1875_v11 }
  0x4e   : > { %1746 = vmatprep.subr.bf16.mxu0 %v1878_v14 }
  0x51   : > { %1747 = vmatpush3.bf16.msra.mxu0 %v1879_v15 }
  0x52   : > { %1748 = vmatprep.subr.bf16.mxu0 %v1882_v18 }
  0x55   : > { %1749 = vmatpush3.bf16.msra.mxu0 %v1883_v19 }
  0x56   : > { %1750 = vmatprep.subr.bf16.mxu0 %v1886_v22 }
  0x59   : > { %1751 = vmatpush3.bf16.msra.mxu0 %v1887_v23 }
  0x5a   : > { %1752 = vmatprep.subr.bf16.mxu0 %v1890_v26 }
  0x5d   : > { %1753 = vmatpush3.bf16.msra.mxu0 %v1891_v27 }
  0x5e   : > { %1754 = vmatprep.subr.bf16.mxu0 %v1894_v30 }
  0x61   : > { %1755 = vmatpush3.bf16.msra.mxu0 %v1895_v34 }
  0x62   : > { %1756 = vmatprep.subr.bf16.mxu0 %v1898_v40 }
  0x65   : > { %1757 = vmatpush3.bf16.msra.mxu0 %v1899_v41 }
  0x66   : > { %1758 = vmatprep.subr.bf16.mxu0 %v1902_v43 }
  0x69   : > { %1759 = vmatpush3.bf16.msra.mxu0 %v1903_v45 }
  0xec   : > { %v1666_v47 = vpop.f32.mrf.mxu0 }
  0xee   : > { %v1667_v48 = vpop.f32.mrf.mxu0  ;;  %v1694_v49 = vpop.f32.mrf.mxu1 }
  0xef   : > { %v1668_v60 = vadd.f32 %v1667_v48, %v1666_v47 }
  0xf0   : > { %v1669_v50 = vpop.f32.mrf.mxu0  ;;  %v1695_v51 = vpop.f32.mrf.mxu1 }
  0xf1   : > { %v678_v2 = vadd.f32 %v1668_v60, %v1532_v61  ;;  %v1696_v4 = vadd.f32 %v1695_v51, %v1694_v49 }
  0xf2   : > { %v1670_v52 = vpop.f32.mrf.mxu0  ;;  %v1697_v53 = vpop.f32.mrf.mxu1 }
  0xf3   : > { %v1671_v62 = vadd.f32 %v1670_v52, %v1669_v50  ;;  %v727_v15 = vadd.f32 %v1696_v4, %v678_v2  ;;  %v1574_v2 = vld [vmem:[%s2236_s28] ss:$0 sm:$0xff] }
  0xf4   : > { %v1672_v54 = vpop.f32.mrf.mxu0  ;;  %v1698_v55 = vpop.f32.mrf.mxu1 }
  0xf5   : > { %v681_v5 = vadd.f32 %v1671_v62, %v1532_v61  ;;  %v1699_v6 = vadd.f32 %v1698_v55, %v1697_v53 }
  0xf6   : > { %v1673_v56 = vpop.f32.mrf.mxu0  ;;  %v1700_v57 = vpop.f32.mrf.mxu1 }
  0xf7   : > { %v1674_v1 = vadd.f32 %v1673_v56, %v1672_v54  ;;  %v730_v16 = vadd.f32 %v1699_v6, %v681_v5 }
  0xf8   : > { %v1675_v58 = vpop.f32.mrf.mxu0  ;;  %v1701_v59 = vpop.f32.mrf.mxu1 }
  0xf9   : > { %v686_v10 = vadd.f32 %v1674_v1, %v1532_v61  ;;  %v1702_v11 = vadd.f32 %v1701_v59, %v1700_v57 }
  0xfa   : > { %v1676_v63 = vpop.f32.mrf.mxu0  ;;  %v1703_v0 = vpop.f32.mrf.mxu1 }
  0xfb   : > { %v1677_v7 = vadd.f32 %v1676_v63, %v1675_v58  ;;  %v735_v18 = vadd.f32 %v1702_v11, %v686_v10 }
  0xfc   : > { %v1704_v8 = vpop.f32.mrf.mxu1 }
  0xfd   : > { %v689_v13 = vadd.f32 %v1677_v7, %v1532_v61  ;;  %v1705_v14 = vadd.f32 %v1704_v8, %v1703_v0  ;;  %v1573_v61 = vld [vmem:[%s2236_s28 + $0x1] ss:$0 sm:$0xff] }
  0xff   : > { %v738_v22 = vadd.f32 %v1705_v14, %v689_v13 }
 0x10c   : > { %v1800_v3 = vpop.f32.mrf.mxu0 }
 0x10d   : > { %v784_v21 = vadd.f32 %v1800_v3, %v735_v18 }
 0x10e   : > { %v775_v9 = vpop.f32.mrf.mxu0 }
 0x10f   : > { %v776_v19 = vadd.f32 %v775_v9, %v727_v15 }
 0x110   : > { %v1801_v12 = vpop.f32.mrf.mxu0 }
 0x111   : > { %v787_v24 = vadd.f32 %v1801_v12, %v738_v22 }
 0x112   : > { %v778_v17 = vpop.f32.mrf.mxu0 }
 0x113   : > { %v779_v20 = vadd.f32 %v778_v17, %v730_v16 }
 0x115   : > { %v792_v23 = vadd.f32 %v779_v20, %v776_v19 }
 0x117   : > { %v793_v25 = vadd.f32 %v792_v23, %v784_v21 }
 0x119   : > { %v794_v26 = vadd.f32 %v793_v25, %v787_v24 }
 0x11b   : > { %v795_v27 = vrot.slane %v794_v26, 4 }
 0x11d   : > { %v796_v28 = vadd.f32 %v795_v27, %v794_v26 }
 0x11f   : > { %v797_v29 = vrot.slane %v796_v28, 2 }
 0x121   : > { %v798_v30 = vadd.f32 %v797_v29, %v796_v28 }
 0x123   : > { %v799_v34 = vrot.slane %v798_v30, 1 }
 0x125   : > { %v800_v35 = vadd.f32 %v799_v34, %v798_v30 }
 0x127   : > { %v802_v39 = vmul.f32 0.03125, %v800_v35 }
 0x129   : > { %v803_v40 = vsub.f32 %v776_v19, %v802_v39  ;;  %v804_v41 = vsub.f32 %v779_v20, %v802_v39  ;;  %v805_v42 = vsub.f32 %v784_v21, %v802_v39  ;;  %v806_v43 = vsub.f32 %v787_v24, %v802_v39  ;;  %v1905_v39 = vld [vmem:[%s2284_s3 + $0x130] sm:$0xff]  }
 0x12b   : > { %v807_v44 = vmul.f32 %v803_v40, %v803_v40  ;;  %v808_v45 = vmul.f32 %v804_v41, %v804_v41  ;;  %v809_v47 = vmul.f32 %v805_v42, %v805_v42  ;;  %v810_v49 = vmul.f32 %v806_v43, %v806_v43 }
 0x12d   : > { %v811_v48 = vadd.f32 %v808_v45, %v807_v44 }
 0x12f   : > { %v812_v50 = vadd.f32 %v811_v48, %v809_v47 }
 0x131   : > { %v813_v51 = vadd.f32 %v812_v50, %v810_v49  ;;  %v1907_v49 = vld [vmem:[%s2284_s3 + $0x120] sm:$0xff]  }
 0x133   : > { %v814_v52 = vrot.slane %v813_v51, 4 }
 0x135   : > { %v815_v53 = vadd.f32 %v814_v52, %v813_v51  ;;  %v1908_v51 = vld [vmem:[%s2284_s3 + $0x118] sm:$0xff]   ;;  %v1909_v52 = vld [vmem:[%s2284_s3 + $0x110] sm:$0xff]  }
 0x137   : > { %v816_v54 = vrot.slane %v815_v53, 2 }
 0x139   : > { %v817_v55 = vadd.f32 %v816_v54, %v815_v53  ;;  %v1910_v53 = vld [vmem:[%s2284_s3 + $0x108] sm:$0xff]   ;;  %v1911_v54 = vld [vmem:[%s2284_s3 + $0x100] sm:$0xff]  }
 0x13b   : > { %v818_v56 = vrot.slane %v817_v55, 1 }
 0x13d   : > { %v819_v57 = vadd.f32 %v818_v56, %v817_v55 }
 0x13f   : > { %v820_v58 = vmul.f32 0.03125, %v819_v57 }
 0x141   : > { %v821_v59 = vadd.f32 1e-05, %v820_v58 }
 0x143   : > { %1912 = vrsqrt.f32 %v821_v59 }
 0x150   : > { %v1913_v60 = vpop.eup %1912 }
 0x151   : > { %v823_v62 = vmul.f32 %v1913_v60, %v803_v40  ;;  %v824_v63 = vmul.f32 %v1913_v60, %v804_v41  ;;  %v825_v0 = vmul.f32 %v1913_v60, %v805_v42  ;;  %v826_v1 = vmul.f32 %v1913_v60, %v806_v43  ;;  %v1906_v42 = vld [vmem:[%s2284_s3 + $0x128] sm:$0xff]  }
 0x153   : > { %v831_v3 = vmul.f32 %v1573_v61, %v823_v62  ;;  %v832_v4 = vmul.f32 %v1573_v61, %v824_v63  ;;  %v833_v5 = vmul.f32 %v1573_v61, %v825_v0  ;;  %v834_v6 = vmul.f32 %v1573_v61, %v826_v1 }
 0x155   : > { %v839_v7 = vadd.f32 %v1574_v2, %v831_v3  ;;  %v840_v8 = vadd.f32 %v1574_v2, %v832_v4  ;;  %v841_v9 = vadd.f32 %v1574_v2, %v833_v5  ;;  %v842_v10 = vadd.f32 %v1574_v2, %v834_v6 }
 0x157   : > { %vm843_vm0 = vcmp.ge.f32.partialorder %v839_v7, 0.0  ;;  %vm844_vm1 = vcmp.ge.f32.partialorder %v840_v8, 0.0  ;;  %vm845_vm2 = vcmp.ge.f32.partialorder %v841_v9, 0.0  ;;  %vm846_vm3 = vcmp.ge.f32.partialorder %v842_v10, 0.0 }
 0x158   : > { %v847_v11 = vmul.f32 0.0, %v839_v7  ;;  %v848_v12 = vmul.f32 0.0, %v840_v8  ;;  %v849_v13 = vmul.f32 0.0, %v841_v9  ;;  %v850_v14 = vmul.f32 0.0, %v842_v10 }
 0x15a   : > { %v851_v15 = vsel %vm843_vm0, %v839_v7, %v847_v11  ;;  %v852_v16 = vsel %vm844_vm1, %v840_v8, %v848_v12  ;;  %v853_v17 = vsel %vm845_vm2, %v841_v9, %v849_v13  ;;  %v854_v18 = vsel %vm846_vm3, %v842_v10, %v850_v14  ;;  %v1575_v9 = vld [vmem:[%s2285_s4] ss:$0 sm:$0xff] }
 0x15b   : > { %859 = vst [vmem:[#allocation2 - $0x2] sm:$0x4] %v851_v15  ;;  %860 = vst [vmem:[#allocation2] sm:$0x2] %v851_v15  ;;  %v885_v34 = vpack.c.bf16 %v852_v16, %v851_v15  ;;  %v890_v50 = vpack.c.bf16 %v854_v18, %v853_v17 }
 0x15c   : > { %861 = vst [vmem:[#allocation2 + $0x1c] sm:$0x40] %v854_v18  ;;  %862 = vst [vmem:[#allocation2 + $0x1e] sm:$0x20] %v854_v18 }
 0x15d   : > { %855 = vst [vmem:[#allocation2 + $0x2] sm:$0xff] %v851_v15  ;;  %856 = vst [vmem:[#allocation2 + $0xa] sm:$0xff] %v852_v16 }
 0x15e   : > { %857 = vst [vmem:[#allocation2 + $0x12] sm:$0xff] %v853_v17  ;;  %858 = vst [vmem:[#allocation2 + $0x1a] sm:$0xff] %v854_v18 }
 0x164   : > { %v867_v19 = vld [vmem:[#allocation2 + $0x1] sm:$0xff]  ;;  %v868_v20 = vld [vmem:[#allocation2 + $0x9] sm:$0xff] }
 0x165   : > { %v875_v21 = vld [vmem:[#allocation2 + $0x3] sm:$0xff]  ;;  %v884_v22 = vpack.c.bf16 %v868_v20, %v867_v19  ;;  %v876_v23 = vld [vmem:[#allocation2 + $0xb] sm:$0xff]  ;;  %v870_v29 = vld [vmem:[#allocation2 + $0x19] sm:$0xff] }
 0x166   : > { %v863_v24 = vld [vmem:[#allocation2] sm:$0xff]  ;;  %v864_v25 = vld [vmem:[#allocation2 + $0x8] sm:$0xff]  ;;  %v886_v26 = vpack.c.bf16 %v876_v23, %v875_v21  ;;  %v869_v28 = vld [vmem:[#allocation2 + $0x11] sm:$0xff] }
 0x167   : > { %v883_v27 = vpack.c.bf16 %v864_v25, %v863_v24  ;;  %v877_v30 = vld [vmem:[#allocation2 + $0x13] sm:$0xff]  ;;  %1252 = vmatprep.mubr.bf16.mxu1 %v884_v22  ;;  %v878_v35 = vld [vmem:[#allocation2 + $0x1b] sm:$0xff]  ;;  %v889_v40 = vpack.c.bf16 %v870_v29, %v869_v28  ;;  %v879_v45 = vld [vmem:[#allocation2 + $0x4] sm:$0xff] }
 0x168   : > { %1301 = vmatprep.mubr.bf16.mxu0 %v886_v26  ;;  %v891_v41 = vpack.c.bf16 %v878_v35, %v877_v30  ;;  %v865_v43 = vld [vmem:[#allocation2 + $0x10] sm:$0xff]  ;;  %v866_v44 = vld [vmem:[#allocation2 + $0x18] sm:$0xff] }
 0x169   : > { %1253 = vmatmul.mubr.bf16.vlgmr.msra.gmra.mxu1 %v883_v27  ;;  %1302 = vmatmul.mubr.bf16.vlgmr.msra.gmra.mxu0 %v885_v34  ;;  %v880_v47 = vld [vmem:[#allocation2 + $0xc] sm:$0xff]  ;;  %v888_v48 = vpack.c.bf16 %v866_v44, %v865_v43  ;;  %v881_v55 = vld [vmem:[#allocation2 + $0x14] sm:$0xff]  ;;  %v882_v56 = vld [vmem:[#allocation2 + $0x1c] sm:$0xff] }
 0x16a   : > { %1803 = vmatpush3.bf16.msra.mxu1 %v2226_v46  ;;  %1260 = vmatprep.mubr.bf16.mxu1 %v889_v40  ;;  %v887_v46 = vpack.c.bf16 %v880_v47, %v879_v45  ;;  %v892_v57 = vpack.c.bf16 %v882_v56, %v881_v55 }
 0x16b   : > { %1309 = vmatprep.mubr.bf16.mxu0 %v891_v41  ;;  %1804 = vmatprep.subr.bf16.mxu1 %v1905_v39 }
 0x16e   : > { %1805 = vmatpush3.bf16.msra.mxu1 %v1905_v39 }
 0x16f   : > { %1806 = vmatprep.subr.bf16.mxu1 %v1906_v42 }
 0x171   : > { %1261 = vmatmul.mubr.bf16.gmra.mxu1 %v888_v48  ;;  %1310 = vmatmul.mubr.bf16.gmra.mxu0 %v890_v50 }
 0x172   : > { %1807 = vmatpush3.bf16.msra.mxu1 %v1906_v42  ;;  %1818 = vmatprep.mubr.bf16.mxu1 %v887_v46 }
 0x173   : > { %1808 = vmatprep.subr.bf16.mxu1 %v1907_v49 }
 0x176   : > { %1809 = vmatpush3.bf16.msra.mxu1 %v1907_v49 }
 0x177   : > { %1810 = vmatprep.subr.bf16.mxu1 %v1908_v51 }
 0x17a   : > { %1811 = vmatpush3.bf16.msra.mxu1 %v1908_v51 }
 0x17b   : > { %1812 = vmatprep.subr.bf16.mxu1 %v1909_v52 }
 0x17e   : > { %1813 = vmatpush3.bf16.msra.mxu1 %v1909_v52 }
 0x17f   : > { %1814 = vmatprep.subr.bf16.mxu1 %v1910_v53 }
 0x182   : > { %1815 = vmatpush3.bf16.msra.mxu1 %v1910_v53 }
 0x183   : > { %1816 = vmatprep.subr.bf16.mxu1 %v1911_v54 }
 0x186   : > { %1817 = vmatpush3.bf16.msra.mxu1 %v1911_v54 }
 0x189   : > { %1819 = vmatmul.mubr.bf16.vlgmr.msra.gmra.mxu1 %v892_v57 }
 0x229   : > { %v1732_v58 = vpop.f32.mrf.mxu1  ;;  %v1760_v60 = vpop.f32.mrf.mxu0 }
 0x22b   : > { %v1733_v59 = vpop.f32.mrf.mxu1  ;;  %v1761_v62 = vpop.f32.mrf.mxu0 }
 0x22c   : > { %v1734_v7 = vadd.f32 %v1733_v59, %v1732_v58  ;;  %v1762_v18 = vadd.f32 %v1761_v62, %v1760_v60 }
 0x22d   : > { %v1735_v61 = vpop.f32.mrf.mxu1  ;;  %v1763_v0 = vpop.f32.mrf.mxu0 }
 0x22e   : > { %v1255_v14 = vadd.f32 %v1734_v7, %v1575_v9  ;;  %v1616_v7 = vld [vmem:[%s2236_s28 + $0x3] ss:$0 sm:$0xff] }
 0x22f   : > { %v1736_v63 = vpop.f32.mrf.mxu1  ;;  %v1764_v2 = vpop.f32.mrf.mxu0 }
 0x230   : > { %v1737_v8 = vadd.f32 %v1736_v63, %v1735_v61  ;;  %v1765_v19 = vadd.f32 %v1764_v2, %v1763_v0  ;;  %v1304_v25 = vadd.f32 %v1762_v18, %v1255_v14 }
 0x231   : > { %v1738_v1 = vpop.f32.mrf.mxu1  ;;  %v1766_v4 = vpop.f32.mrf.mxu0 }
 0x232   : > { %v1258_v15 = vadd.f32 %v1737_v8, %v1575_v9 }
 0x233   : > { %v1739_v3 = vpop.f32.mrf.mxu1  ;;  %v1767_v6 = vpop.f32.mrf.mxu0 }
 0x234   : > { %v1740_v11 = vadd.f32 %v1739_v3, %v1738_v1  ;;  %v1768_v23 = vadd.f32 %v1767_v6, %v1766_v4  ;;  %v1307_v26 = vadd.f32 %v1765_v19, %v1258_v15 }
 0x235   : > { %v1741_v5 = vpop.f32.mrf.mxu1  ;;  %v1769_v12 = vpop.f32.mrf.mxu0 }
 0x236   : > { %v1263_v20 = vadd.f32 %v1740_v11, %v1575_v9 }
 0x237   : > { %v1742_v10 = vpop.f32.mrf.mxu1  ;;  %v1770_v21 = vpop.f32.mrf.mxu0 }
 0x238   : > { %v1743_v16 = vadd.f32 %v1742_v10, %v1741_v5  ;;  %v1771_v28 = vadd.f32 %v1770_v21, %v1769_v12  ;;  %v1312_v29 = vadd.f32 %v1768_v23, %v1263_v20  ;;  %v1617_v12 = vld [vmem:[%s2236_s28 + $0x2] ss:$0 sm:$0xff] }
 0x23a   : > { %v1266_v24 = vadd.f32 %v1743_v16, %v1575_v9 }
 0x23c   : > { %v1315_v39 = vadd.f32 %v1771_v28, %v1266_v24 }
 0x249   : > { %v1820_v13 = vpop.f32.mrf.mxu1 }
 0x24a   : > { %v1361_v35 = vadd.f32 %v1820_v13, %v1312_v29 }
 0x24b   : > { %v1352_v17 = vpop.f32.mrf.mxu1 }
 0x24c   : > { %v1353_v30 = vadd.f32 %v1352_v17, %v1304_v25 }
 0x24d   : > { %v1821_v22 = vpop.f32.mrf.mxu1 }
 0x24e   : > { %v1364_v41 = vadd.f32 %v1821_v22, %v1315_v39 }
 0x24f   : > { %v1355_v27 = vpop.f32.mrf.mxu1 }
 0x250   : > { %v1356_v34 = vadd.f32 %v1355_v27, %v1307_v26 }
 0x252   : > { %v1367_v40 = vadd.f32 %v1356_v34, %v1353_v30 }
 0x254   : > { %v1368_v42 = vadd.f32 %v1367_v40, %v1361_v35 }
 0x256   : > { %v1369_v43 = vadd.f32 %v1368_v42, %v1364_v41 }
 0x258   : > { %v1370_v44 = vrot.slane %v1369_v43, 4 }
 0x25a   : > { %v1371_v45 = vadd.f32 %v1370_v44, %v1369_v43 }
 0x25c   : > { %v1372_v47 = vrot.slane %v1371_v45, 2 }
 0x25e   : > { %v1373_v48 = vadd.f32 %v1372_v47, %v1371_v45 }
 0x260   : > { %v1374_v49 = vrot.slane %v1373_v48, 1 }
 0x262   : > { %v1375_v50 = vadd.f32 %v1374_v49, %v1373_v48 }
 0x264   : > { %v1376_v46 = vmul.f32 0.03125, %v1375_v50 }
 0x266   : > { %v1377_v51 = vsub.f32 %v1353_v30, %v1376_v46  ;;  %v1378_v52 = vsub.f32 %v1356_v34, %v1376_v46  ;;  %v1379_v53 = vsub.f32 %v1361_v35, %v1376_v46  ;;  %v1380_v54 = vsub.f32 %v1364_v41, %v1376_v46 }
 0x268   : > { %v1381_v55 = vmul.f32 %v1377_v51, %v1377_v51  ;;  %v1382_v56 = vmul.f32 %v1378_v52, %v1378_v52  ;;  %v1383_v57 = vmul.f32 %v1379_v53, %v1379_v53  ;;  %v1384_v59 = vmul.f32 %v1380_v54, %v1380_v54 }
 0x26a   : > { %v1385_v58 = vadd.f32 %v1382_v56, %v1381_v55 }
 0x26c   : > { %v1386_v60 = vadd.f32 %v1385_v58, %v1383_v57 }
 0x26e   : > { %v1387_v61 = vadd.f32 %v1386_v60, %v1384_v59 }
 0x270   : > { %v1388_v62 = vrot.slane %v1387_v61, 4 }
 0x272   : > { %v1389_v63 = vadd.f32 %v1388_v62, %v1387_v61 }
 0x274   : > { %v1390_v0 = vrot.slane %v1389_v63, 2 }
 0x276   : > { %v1391_v1 = vadd.f32 %v1390_v0, %v1389_v63 }
 0x278   : > { %v1392_v2 = vrot.slane %v1391_v1, 1 }
 0x27a   : > { %v1393_v3 = vadd.f32 %v1392_v2, %v1391_v1 }
 0x27c   : > { %v1394_v4 = vmul.f32 0.03125, %v1393_v3 }
 0x27e   : > { %v1395_v5 = vadd.f32 1e-05, %v1394_v4 }
 0x280   : > { %1914 = vrsqrt.f32 %v1395_v5 }
 0x28d   : > { %v1915_v6 = vpop.eup %1914 }
 0x28e   : > { %v1397_v8 = vmul.f32 %v1915_v6, %v1377_v51  ;;  %v1398_v9 = vmul.f32 %v1915_v6, %v1378_v52  ;;  %v1399_v10 = vmul.f32 %v1915_v6, %v1379_v53  ;;  %v1400_v11 = vmul.f32 %v1915_v6, %v1380_v54 }
 0x290   : > { %v1407_v13 = vmul.f32 %v1616_v7, %v1397_v8  ;;  %v1408_v14 = vmul.f32 %v1616_v7, %v1398_v9  ;;  %v1409_v15 = vmul.f32 %v1616_v7, %v1399_v10  ;;  %v1410_v16 = vmul.f32 %v1616_v7, %v1400_v11 }
 0x292   : > { %v1415_v17 = vadd.f32 %v1617_v12, %v1407_v13  ;;  %v1416_v18 = vadd.f32 %v1617_v12, %v1408_v14  ;;  %v1417_v19 = vadd.f32 %v1617_v12, %v1409_v15  ;;  %v1418_v20 = vadd.f32 %v1617_v12, %v1410_v16 }
 0x294   : > { %vm1419_vm4 = vcmp.ge.f32.partialorder %v1415_v17, 0.0  ;;  %vm1420_vm5 = vcmp.ge.f32.partialorder %v1416_v18, 0.0  ;;  %vm1421_vm6 = vcmp.ge.f32.partialorder %v1417_v19, 0.0  ;;  %vm1422_vm7 = vcmp.ge.f32.partialorder %v1418_v20, 0.0 }
 0x295   : > { %v1423_v21 = vmul.f32 0.0, %v1415_v17  ;;  %v1424_v22 = vmul.f32 0.0, %v1416_v18  ;;  %v1425_v23 = vmul.f32 0.0, %v1417_v19  ;;  %v1426_v24 = vmul.f32 0.0, %v1418_v20 }
 0x297   : > { %v1427_v25 = vsel %vm1419_vm4, %v1415_v17, %v1423_v21  ;;  %v1428_v26 = vsel %vm1420_vm5, %v1416_v18, %v1424_v22  ;;  %v1429_v27 = vsel %vm1421_vm6, %v1417_v19, %v1425_v23  ;;  %v1430_v28 = vsel %vm1422_vm7, %v1418_v20, %v1426_v24 }
 0x298   : > { %v1431_v29 = vadd.f32 %v2078_v32, %v1427_v25  ;;  %v1432_v30 = vadd.f32 %v1633_v33, %v1428_v26  ;;  %v1433_v34 = vadd.f32 %v1636_v37, %v1429_v27  ;;  %v1434_v35 = vadd.f32 %v2097_v38, %v1430_v28 }
 0x29a   : > { %v1641_v39 = vpack.c.bf16 %v1432_v30, %v1431_v29  ;;  %v1646_v40 = vpack.c.bf16 %v1434_v35, %v1433_v34 }
 0x29c   : > { %1642 = vst [vmem:[%s268_s26] sm:$0xff] %v1641_v39   ;;  %1649 = vst [vmem:[%s268_s26 + $0x8] sm:$0xff] %v1646_v40  }
 0x29d PF: > { %s16_s21 = sadd.s32 1, %s1922_s21  }
 0x29e   : > { %p13_p4 = scmp.ge.s32.totalorder %s16_s21, 4  }
 0x2a0   :  { %15 = sbr.rel (!%p13_p4) target bundleno = 1 (0x1), region = 77 }

// kernel: decoder_forward.5
= control target key start
LH: loop header
LB: loop body
LE: loop exit
PB: predicated region body
PF: predicated region fallthrough
CT: control target
= control target key end

     0   :  { %11 = vsyncpa [#allocation4], 0  ;;  %s2123_s21 = smov 0   ;;  %s2321_s0 = inlined_call_operand.vmem [shape: bf16[2,16,128], index: 0, kind: input, shape index: {}]   ;;  %s2322_s1 = inlined_call_operand.vmem [shape: bf16[640,128], index: 1, kind: input, shape index: {}]   ;;  %s2323_s2 = inlined_call_operand.vmem [shape: f32[1,128], index: 2, kind: input, shape index: {}]   ;;  %s2324_s3 = inlined_call_operand.hbm [shape: bf16[640,256], index: 3, kind: input, shape index: {}]   ;;  %s2325_s4 = inlined_call_operand.vmem [shape: f32[1,256], index: 4, kind: input, shape index: {}]   ;;  %s2326_s5 = inlined_call_operand.vmem [shape: f32[2,4,128], index: 5, kind: input, shape index: {}]   ;;  %s2327_s6 = inlined_call_operand.vmem [shape: bf16[2,16,256], index: 6, kind: output, shape index: {}]  }
   0x1 LB: > { %s2129_s22 = sadd.s32 4294967295, %s2080_s21   ;;  %p1635_p0 = scmp.ge.s32.totalorder %s2080_s21, 1  ;;  %s2080_s21 = sphi %s2123_s21, %s17_s21  }
   0x2   : > { %p184_p1 = scmp.lt.s32.totalorder %s2080_s21, 3  ;;  %s2082_s23 = smov [#allocation3]  }
   0x3   : > { %s202_s24 = sshll.u32 %s2082_s23, 4  ;;  %p1863_p3 = scmp.eq.s32.totalorder %s2129_s22, 0  ;;  %s203_s24 = int_to_ptr.vmem [resolvable:$true] %s202_s24 }
   0x4   : > { %p2133_p2 = pnand %p1635_p0, %p184_p1  ;;  %s2055_s26 = scalar_lea.vmem %s203_s24, 10240 }
   0x5   : > { %p2056_p7 = scmp.ne.s32.totalorder %s203_s24, %s2055_s26  ;;  %p2063_p10 = scmp.lt.s32.totalorder %s203_s24, %s203_s24 }
   0x6   : > { %p1859_p4 = pneg %p2133_p2  ;;  %p2064_p11 = scmp.lt.s32.totalorder %s2055_s26, %s2055_s26 }
   0x8   : > { %p1860_p5 = pnand %p1863_p3, %p1859_p4  ;;  %p2065_p12 = por %p2064_p11, %p2063_p10 }
   0xa   : > { %p2046_p6 = pneg %p1860_p5 }
   0xc   : > { %p2058_p8 = pnand %p2056_p7, %p2046_p6 }
   0xe   : > { %p2059_p9 = pneg %p2058_p8 }
  0x10   : > { %p2066_p13 = pnand %p2065_p12, %p2059_p9 }
  0x12   : > { %2069 = shalt.err (!%p2066_p13)
}
  0x13   : > { %s2083_s27 = smov 128   ;;  %s2084_s28 = smov 8  }
  0x14   : > { %1862 = dma.hbm_to_vmem [thread:$0]  (!%p1860_p5), %s2324_s3, 10240, %s203_s24, [#allocation4], %s2083_s27, %s2083_s27, %s2084_s28  }
  0x15   : > { %236 = sbr.rel (%p2133_p2) target bundleno = 678 (0x2a6), region = 44 }
  0x1a   : > { %2075 = dma.done.wait (%p1863_p3), [#allocation4], 10240  }
  0x1b   : > { %2077 = vsyncadd (%p1863_p3), [#allocation4], 4294957056  ;;  %v1879_v0 = vld [vmem:[%s2322_s1 + $0x78] sm:$0xff]   ;;  %v1883_v4 = vld [vmem:[%s2322_s1 + $0x70] sm:$0xff]   ;;  %p270_p0 = scmp.lt.s32.totalorder %s2129_s22, 1  ;;  %v2085_v35 = vmov 0.0  }
  0x1c   : > { %v1880_v1 = vld [vmem:[%s2322_s1 + $0x38] sm:$0xff]   ;;  %1782 = vmatprep.subr.bf16.mxu0 %v1879_v0  ;;  %v1884_v5 = vld [vmem:[%s2322_s1 + $0x30] sm:$0xff]   ;;  %v1887_v8 = vld [vmem:[%s2322_s1 + $0x68] sm:$0xff]   ;;  %vm2086_vm0 = vmmov 0  }
  0x1d   : > { %v1881_v2 = vld [vmem:[%s2322_s1 + $0xf8] sm:$0xff]   ;;  %1783 = vmatpush3.bf16.msra.mxu0 %v1880_v1  ;;  %v1885_v6 = vld [vmem:[%s2322_s1 + $0xf0] sm:$0xff]   ;;  %v1888_v9 = vld [vmem:[%s2322_s1 + $0x28] sm:$0xff]   ;;  %s2330_s22 = smov (!%p270_p0, %s2129_s22), 1 }
  0x1e   : > { %v1882_v3 = vld [vmem:[%s2322_s1 + $0xb8] sm:$0xff]   ;;  %1804 = vmatprep.subr.bf16.mxu1 %v1881_v2  ;;  %1784 = vmatprep.subr.bf16.mxu0 %v1883_v4  ;;  %v1886_v7 = vld [vmem:[%s2322_s1 + $0xb0] sm:$0xff]   ;;  %v1889_v10 = vld [vmem:[%s2322_s1 + $0xe8] sm:$0xff]   ;;  %s1774_s15 = sshll.u32 %s2330_s22, 3  ;;  %s1642_s29 = sshll.u32 %s2330_s22, 2 }
  0x1f   : > { %1805 = vmatpush3.bf16.msra.mxu1 %v1882_v3  ;;  %v1890_v11 = vld [vmem:[%s2322_s1 + $0xa8] sm:$0xff]   ;;  %v1891_v12 = vld [vmem:[%s2322_s1 + $0x60] sm:$0xff]   ;;  %v1895_v16 = vld [vmem:[%s2322_s1 + $0x58] sm:$0xff]   ;;  %s274_s26 = scalar_lea.vmem %s2321_s0, %s1774_s15  ;;  %s2296_s8 = scalar_lea.vmem %s2326_s5, %s1642_s29 }
  0x20   : > { %1806 = vmatprep.subr.bf16.mxu1 %v1885_v6  ;;  %v1892_v13 = vld [vmem:[%s2322_s1 + $0x20] sm:$0xff]   ;;  %v1896_v17 = vld [vmem:[%s2322_s1 + $0x18] sm:$0xff]   ;;  %v1899_v20 = vld [vmem:[%s2322_s1 + $0x50] sm:$0xff]   ;;  %s1775_s11 = sshll.u32 %s2330_s22, 4 }
  0x21   : > { %1785 = vmatpush3.bf16.msra.mxu0 %v1884_v5  ;;  %v1893_v14 = vld [vmem:[%s2322_s1 + $0xe0] sm:$0xff]   ;;  %v1897_v18 = vld [vmem:[%s2322_s1 + $0xd8] sm:$0xff]   ;;  %v1900_v21 = vld [vmem:[%s2322_s1 + $0x10] sm:$0xff]   ;;  %s283_s14 = scalar_lea.vmem %s2327_s6, %s1775_s11 }
  0x22   : > { %1786 = vmatprep.subr.bf16.mxu0 %v1887_v8  ;;  %v1894_v15 = vld [vmem:[%s2322_s1 + $0xa0] sm:$0xff]   ;;  %v1898_v19 = vld [vmem:[%s2322_s1 + $0x98] sm:$0xff]   ;;  %v1901_v22 = vld [vmem:[%s2322_s1 + $0xd0] sm:$0xff]  }
  0x23   : > { %1807 = vmatpush3.bf16.msra.mxu1 %v1886_v7  ;;  %v1902_v23 = vld [vmem:[%s2322_s1 + $0x90] sm:$0xff]   ;;  %v1903_v24 = vld [vmem:[%s2322_s1 + $0x48] sm:$0xff]   ;;  %v1907_v28 = vld [vmem:[%s2322_s1 + $0x40] sm:$0xff]  }
  0x24   : > { %1808 = vmatprep.subr.bf16.mxu1 %v1889_v10  ;;  %v1904_v25 = vld [vmem:[%s2322_s1 + $0x8] sm:$0xff]   ;;  %v1908_v29 = vld [vmem:[%s2322_s1] sm:$0xff]   ;;  %v1911_v36 = vld [vmem:[%s2322_s1 + $0x138] sm:$0xff]  }
  0x25   : > { %1787 = vmatpush3.bf16.msra.mxu0 %v1888_v9  ;;  %v1905_v26 = vld [vmem:[%s2322_s1 + $0xc8] sm:$0xff]   ;;  %v1909_v30 = vld [vmem:[%s2322_s1 + $0xc0] sm:$0xff]   ;;  %v1913_v47 = vld [vmem:[%s2322_s1 + $0x130] sm:$0xff]  }
  0x26   : > { %1788 = vmatprep.subr.bf16.mxu0 %v1891_v12  ;;  %v1906_v27 = vld [vmem:[%s2322_s1 + $0x88] sm:$0xff]   ;;  %v1779_v31 = vld [vmem:[%s274_s26] sm:$0xff]   ;;  %v1916_v50 = vld [vmem:[%s2322_s1 + $0x118] sm:$0xff]  }
  0x27   : > { %1809 = vmatpush3.bf16.msra.mxu1 %v1890_v11  ;;  %v2252_v32 = vunpack.c.l.bf16 %v1779_v31  ;;  %v2254_v33 = vunpack.c.h.bf16 %v1779_v31  ;;  %v1910_v34 = vld [vmem:[%s2322_s1 + $0x80] sm:$0xff]   ;;  %v1914_v48 = vld [vmem:[%s2322_s1 + $0x128] sm:$0xff]   ;;  %v1917_v51 = vld [vmem:[%s2322_s1 + $0x110] sm:$0xff]  }
  0x28   : > { %1810 = vmatprep.subr.bf16.mxu1 %v1893_v14  ;;  %v1912_v37 = vld [vmem:[%s274_s26] sm:$0xff]  ;;  %v1918_v52 = vld [vmem:[%s2322_s1 + $0x108] sm:$0xff]  }
  0x29   : > { %1789 = vmatpush3.bf16.msra.mxu0 %v1892_v13  ;;  %289 = vst [vmem:[#allocation2 + $0x2] sm:$0xff] %v2252_v32  ;;  %290 = vst [vmem:[#allocation2 + $0xa] sm:$0xff] %v2254_v33  ;;  %v1915_v49 = vld [vmem:[%s2322_s1 + $0x120] sm:$0xff]   ;;  %v1928_v61 = vld [vmem:[#allocation3 + $0x64] ss:$8 sps:$4 sm:$0xff]  }
  0x2a   : > { %1790 = vmatprep.subr.bf16.mxu0 %v1895_v16  ;;  %292 = vst [vmem:[#allocation2] sm:$0x2] %v2252_v32  ;;  %291 = vst [vmem:[#allocation2 - $0x2] sm:$0x4] %v2252_v32  ;;  %v1919_v53 = vld [vmem:[%s2322_s1 + $0x100] sm:$0xff]  }
  0x2b   : > { %1811 = vmatpush3.bf16.msra.mxu1 %v1894_v15  ;;  %293 = vst [vmem:[#allocation2 + $0xc] sm:$0x40] %v2254_v33  ;;  %294 = vst [vmem:[#allocation2 + $0xe] sm:$0x20] %v2254_v33  ;;  %v1922_v57 = vld [vmem:[#allocation3 + $0x74] ss:$8 sps:$4 sm:$0xff]  }
  0x2c   : > { %1812 = vmatprep.subr.bf16.mxu1 %v1897_v18  ;;  %v1920_v58 = vld [vmem:[#allocation3 + $0x70] ss:$8 sps:$4 sm:$0xff]   ;;  %v1925_v59 = vld [vmem:[#allocation3 + $0x174] ss:$8 sps:$4 sm:$0xff]   ;;  %v1926_v62 = vld [vmem:[#allocation3 + $0x60] ss:$8 sps:$4 sm:$0xff]  }
  0x2d   : > { %1791 = vmatpush3.bf16.msra.mxu0 %v1896_v17  ;;  %v1923_v60 = vld [vmem:[#allocation3 + $0x170] ss:$8 sps:$4 sm:$0xff]   ;;  %v1931_v63 = vld [vmem:[#allocation3 + $0x164] ss:$8 sps:$4 sm:$0xff]   ;;  %v1929_v0 = vld [vmem:[#allocation3 + $0x160] ss:$8 sps:$4 sm:$0xff]  }
  0x2e   : > { %1792 = vmatprep.subr.bf16.mxu0 %v1899_v20  ;;  %v1934_v1 = vld [vmem:[#allocation3 + $0x54] ss:$8 sps:$4 sm:$0xff]   ;;  %v1932_v2 = vld [vmem:[#allocation3 + $0x50] ss:$8 sps:$4 sm:$0xff]   ;;  %v1940_v5 = vld [vmem:[#allocation3 + $0x44] ss:$8 sps:$4 sm:$0xff]  }
  0x2f   : > { %1813 = vmatpush3.bf16.msra.mxu1 %v1898_v19  ;;  %v1937_v3 = vld [vmem:[#allocation3 + $0x154] ss:$8 sps:$4 sm:$0xff]   ;;  %v1935_v4 = vld [vmem:[#allocation3 + $0x150] ss:$8 sps:$4 sm:$0xff]   ;;  %v1938_v6 = vld [vmem:[#allocation3 + $0x40] ss:$8 sps:$4 sm:$0xff]  }
  0x30   : > { %1814 = vmatprep.subr.bf16.mxu1 %v1901_v22  ;;  %v298_v39 = vld [vmem:[#allocation2 + $0x9] sm:$0xff]  ;;  %v1943_v7 = vld [vmem:[#allocation3 + $0x144] ss:$8 sps:$4 sm:$0xff]   ;;  %v1941_v8 = vld [vmem:[#allocation3 + $0x140] ss:$8 sps:$4 sm:$0xff]  }
  0x31   : > { %1793 = vmatpush3.bf16.msra.mxu0 %v1900_v21  ;;  %v297_v38 = vld [vmem:[#allocation2 + $0x1] sm:$0xff]  ;;  %v1946_v9 = vld [vmem:[#allocation3 + $0x34] ss:$8 sps:$4 sm:$0xff]  }
  0x32   : > { %1794 = vmatprep.subr.bf16.mxu0 %v1903_v24  ;;  %v295_v40 = vld [vmem:[#allocation2] sm:$0xff]  ;;  %v306_v41 = vpack.c.bf16 %v298_v39, %v297_v38  ;;  %v296_v42 = vld [vmem:[#allocation2 + $0x8] sm:$0xff] }
  0x33   : > { %1815 = vmatpush3.bf16.msra.mxu1 %v1902_v23  ;;  %v301_v43 = vld [vmem:[#allocation2 + $0x3] sm:$0xff]  ;;  %v302_v44 = vld [vmem:[#allocation2 + $0xb] sm:$0xff]  ;;  %v305_v45 = vpack.c.bf16 %v296_v42, %v295_v40 }
  0x34   : > { %1816 = vmatprep.subr.bf16.mxu1 %v1905_v26  ;;  %v308_v46 = vpack.c.bf16 %v302_v44, %v301_v43  ;;  %669 = vmatprep.mubr.bf16.mxu0 %v306_v41  ;;  %v303_v54 = vld [vmem:[#allocation2 + $0x4] sm:$0xff]  ;;  %v304_v55 = vld [vmem:[#allocation2 + $0xc] sm:$0xff]  ;;  %v1950_v14 = vld [vmem:[#allocation3 + $0x20] ss:$8 sps:$4 sm:$0xff]  }
  0x35   : > { %1795 = vmatpush3.bf16.msra.mxu0 %v1904_v25  ;;  %v309_v56 = vpack.c.bf16 %v304_v55, %v303_v54  ;;  %v1944_v10 = vld [vmem:[#allocation3 + $0x30] ss:$8 sps:$4 sm:$0xff]   ;;  %v1949_v11 = vld [vmem:[#allocation3 + $0x134] ss:$8 sps:$4 sm:$0xff]   ;;  %v1952_v13 = vld [vmem:[#allocation3 + $0x24] ss:$8 sps:$4 sm:$0xff]  }
  0x36   : > { %1796 = vmatprep.subr.bf16.mxu0 %v1907_v28  ;;  %710 = vmatprep.mubr.bf16.mxu1 %v308_v46  ;;  %v1947_v12 = vld [vmem:[#allocation3 + $0x130] ss:$8 sps:$4 sm:$0xff]   ;;  %v1955_v15 = vld [vmem:[#allocation3 + $0x124] ss:$8 sps:$4 sm:$0xff]   ;;  %v1953_v16 = vld [vmem:[#allocation3 + $0x120] ss:$8 sps:$4 sm:$0xff]  }
  0x37   : > { %1817 = vmatpush3.bf16.msra.mxu1 %v1906_v27  ;;  %v1958_v17 = vld [vmem:[#allocation3 + $0x14] ss:$8 sps:$4 sm:$0xff]   ;;  %v1956_v18 = vld [vmem:[#allocation3 + $0x10] ss:$8 sps:$4 sm:$0xff]   ;;  %v1964_v21 = vld [vmem:[#allocation3 + $0x4] ss:$8 sps:$4 sm:$0xff]  }
  0x38   : > { %1818 = vmatprep.subr.bf16.mxu1 %v1909_v30  ;;  %v1961_v19 = vld [vmem:[#allocation3 + $0x114] ss:$8 sps:$4 sm:$0xff]   ;;  %v1959_v20 = vld [vmem:[#allocation3 + $0x110] ss:$8 sps:$4 sm:$0xff]   ;;  %v1962_v22 = vld [vmem:[#allocation3] ss:$8 sps:$4 sm:$0xff]  }
  0x39   : > { %1797 = vmatpush3.bf16.msra.mxu0 %v1908_v29  ;;  %v1967_v23 = vld [vmem:[#allocation3 + $0x104] ss:$8 sps:$4 sm:$0xff]   ;;  %v1965_v24 = vld [vmem:[#allocation3 + $0x100] ss:$8 sps:$4 sm:$0xff]   ;;  %v1970_v25 = vld [vmem:[#allocation3 + $0xf4] ss:$8 sps:$4 sm:$0xff]  }
  0x3a   : > { %1835 = vmatprep.subr.bf16.mxu0 %v2085_v35  ;;  %v1968_v26 = vld [vmem:[#allocation3 + $0xf0] ss:$8 sps:$4 sm:$0xff]   ;;  %v1973_v27 = vld [vmem:[#allocation3 + $0x1f4] ss:$8 sps:$4 sm:$0xff]   ;;  %v1976_v29 = vld [vmem:[#allocation3 + $0xe4] ss:$8 sps:$4 sm:$0xff]  }
  0x3b   : > { %1819 = vmatpush3.bf16.msra.mxu1 %v1910_v34  ;;  %v1971_v28 = vld [vmem:[#allocation3 + $0x1f0] ss:$8 sps:$4 sm:$0xff]   ;;  %v1974_v30 = vld [vmem:[#allocation3 + $0xe0] ss:$8 sps:$4 sm:$0xff]   ;;  %v1979_v31 = vld [vmem:[#allocation3 + $0x1e4] ss:$8 sps:$4 sm:$0xff]  }
  0x3c   : > { %670 = vmatmul.mubr.bf16.vlgmr.msra.gmra.mxu0 %v305_v45  ;;  %1318 = vmatprep.subr.bf16.mxu1 %v1922_v57  ;;  %v1977_v34 = vld [vmem:[#allocation3 + $0x1e0] ss:$8 sps:$4 sm:$0xff]   ;;  %v1983_v38 = vld [vmem:[#allocation3 + $0x1d0] ss:$8 sps:$4 sm:$0xff]   ;;  %v1988_v39 = vld [vmem:[#allocation3 + $0xc4] ss:$8 sps:$4 sm:$0xff]  }
  0x3d   : > { %1836 = vmatpush3.bf16.msra.mxu0 %v1911_v36  ;;  %1851 = vmatprep.mubr.msk.bf16.mxu0 %vm2086_vm0, %v2085_v35  ;;  %v1980_v36 = vld [vmem:[#allocation3 + $0xd0] ss:$8 sps:$4 sm:$0xff]   ;;  %v1986_v40 = vld [vmem:[#allocation3 + $0xc0] ss:$8 sps:$4 sm:$0xff]   ;;  %v1991_v41 = vld [vmem:[#allocation3 + $0x1c4] ss:$8 sps:$4 sm:$0xff]  }
  0x3e   : > { %711 = vmatmul.mubr.bf16.vlgmr.msra.gmra.mxu1 %v1912_v37  ;;  %1837 = vmatprep.subr.bf16.mxu0 %v2085_v35  ;;  %v1985_v37 = vld [vmem:[#allocation3 + $0x1d4] ss:$8 sps:$4 sm:$0xff]   ;;  %v1989_v42 = vld [vmem:[#allocation3 + $0x1c0] ss:$8 sps:$4 sm:$0xff]   ;;  %v1992_v44 = vld [vmem:[#allocation3 + $0xb0] ss:$8 sps:$4 sm:$0xff]  }
  0x3f   : > { %1319 = vmatpush1.bf16.msra.mxu1 %v1920_v58  ;;  %v1994_v43 = vld [vmem:[#allocation3 + $0xb4] ss:$8 sps:$4 sm:$0xff]   ;;  %v1995_v46 = vld [vmem:[#allocation3 + $0x1b0] ss:$8 sps:$4 sm:$0xff]   ;;  %v2012_v55 = vld [vmem:[#allocation3 + $0x84] ss:$8 sps:$4 sm:$0xff]  }
  0x40   : > { %1320 = vmatprep.subr.bf16.mxu1 %v1928_v61  ;;  %v1997_v45 = vld [vmem:[#allocation3 + $0x1b4] ss:$8 sps:$4 sm:$0xff]   ;;  %v2010_v57 = vld [vmem:[#allocation3 + $0x80] ss:$8 sps:$4 sm:$0xff]  }
  0x41   : > { %1838 = vmatpush3.bf16.msra.mxu0 %v1913_v47  ;;  %v2000_v47 = vld [vmem:[#allocation3 + $0xa4] ss:$8 sps:$4 sm:$0xff]   ;;  %v2009_v54 = vld [vmem:[#allocation3 + $0x194] ss:$8 sps:$4 sm:$0xff]   ;;  %v2013_v58 = vld [vmem:[#allocation3 + $0x180] ss:$8 sps:$4 sm:$0xff]  }
  0x42   : > { %1839 = vmatprep.subr.bf16.mxu0 %v2085_v35 }
  0x43   : > { %1321 = vmatpush1.bf16.msra.mxu1 %v1926_v62 }
  0x44   : > { %1322 = vmatprep.subr.bf16.mxu1 %v1934_v1 }
  0x45   : > { %1840 = vmatpush3.bf16.msra.mxu0 %v1914_v48  ;;  %v1998_v48 = vld [vmem:[#allocation3 + $0xa0] ss:$8 sps:$4 sm:$0xff]  }
  0x46   : > { %1841 = vmatprep.subr.bf16.mxu0 %v2085_v35 }
  0x47   : > { %1323 = vmatpush1.bf16.msra.mxu1 %v1932_v2 }
  0x48   : > { %1324 = vmatprep.subr.bf16.mxu1 %v1940_v5  ;;  %v1645_v5 = vld [vmem:[%s2323_s2] ss:$0 sm:$0xff] }
  0x49   : > { %1842 = vmatpush3.bf16.msra.mxu0 %v1915_v49  ;;  %v2003_v49 = vld [vmem:[#allocation3 + $0x1a4] ss:$8 sps:$4 sm:$0xff]  }
  0x4a   : > { %1843 = vmatprep.subr.bf16.mxu0 %v2085_v35 }
  0x4b   : > { %1325 = vmatpush1.bf16.msra.mxu1 %v1938_v6 }
  0x4c   : > { %1326 = vmatprep.subr.bf16.mxu1 %v1946_v9 }
  0x4d   : > { %1844 = vmatpush3.bf16.msra.mxu0 %v1916_v50  ;;  %v2001_v50 = vld [vmem:[#allocation3 + $0x1a0] ss:$8 sps:$4 sm:$0xff]  }
  0x4e   : > { %1845 = vmatprep.subr.bf16.mxu0 %v2085_v35 }
  0x4f   : > { %1327 = vmatpush1.bf16.msra.mxu1 %v1944_v10 }
  0x50   : > { %1328 = vmatprep.subr.bf16.mxu1 %v1952_v13 }
  0x51   : > { %1846 = vmatpush3.bf16.msra.mxu0 %v1917_v51  ;;  %v2004_v51 = vld [vmem:[#allocation3 + $0x90] ss:$8 sps:$4 sm:$0xff]  }
  0x52   : > { %1847 = vmatprep.subr.bf16.mxu0 %v2085_v35 }
  0x53   : > { %1329 = vmatpush1.bf16.msra.mxu1 %v1950_v14 }
  0x54   : > { %1330 = vmatprep.subr.bf16.mxu1 %v1958_v17 }
  0x55   : > { %1848 = vmatpush3.bf16.msra.mxu0 %v1918_v52  ;;  %v2006_v52 = vld [vmem:[#allocation3 + $0x94] ss:$8 sps:$4 sm:$0xff]  }
  0x56   : > { %1849 = vmatprep.subr.bf16.mxu0 %v2085_v35  ;;  %v1982_v35 = vld [vmem:[#allocation3 + $0xd4] ss:$8 sps:$4 sm:$0xff]  }
  0x57   : > { %1331 = vmatpush1.bf16.msra.mxu1 %v1956_v18 }
  0x58   : > { %1332 = vmatprep.subr.bf16.mxu1 %v1964_v21 }
  0x59   : > { %1850 = vmatpush3.bf16.msra.mxu0 %v1919_v53  ;;  %v2007_v53 = vld [vmem:[#allocation3 + $0x190] ss:$8 sps:$4 sm:$0xff]  }
  0x5a   : > { %1361 = vmatprep.subr.bf16.mxu0 %v1925_v59  ;;  %v2018_v59 = vld [vmem:[#allocation3 + $0x274] ss:$8 sps:$4 sm:$0xff]  }
  0x5b   : > { %1333 = vmatpush1.bf16.msra.mxu1 %v1962_v22 }
  0x5c   : > { %1852 = vmatmul.mubr.bf16.vlgmr.msra.gmra.mxu0 %v309_v56  ;;  %1334 = vmatprep.subr.bf16.mxu1 %v1970_v25  ;;  %v2015_v56 = vld [vmem:[#allocation3 + $0x184] ss:$8 sps:$4 sm:$0xff]  }
  0x5d   : > { %1362 = vmatpush1.bf16.msra.mxu0 %v1923_v60 }
  0x5e   : > { %1363 = vmatprep.subr.bf16.mxu0 %v1931_v63 }
  0x5f   : > { %1335 = vmatpush2.bf16.msra.mxu1 %v1968_v26 }
  0x60   : > { %1336 = vmatprep.subr.bf16.mxu1 %v1976_v29 }
  0x61   : > { %1364 = vmatpush1.bf16.msra.mxu0 %v1929_v0 }
  0x62   : > { %1365 = vmatprep.subr.bf16.mxu0 %v1937_v3 }
  0x63   : > { %1337 = vmatpush2.bf16.msra.mxu1 %v1974_v30 }
  0x64   : > { %1338 = vmatprep.subr.bf16.mxu1 %v1982_v35 }
  0x65   : > { %1366 = vmatpush1.bf16.msra.mxu0 %v1935_v4 }
  0x66   : > { %1367 = vmatprep.subr.bf16.mxu0 %v1943_v7 }
  0x67   : > { %1339 = vmatpush2.bf16.msra.mxu1 %v1980_v36 }
  0x68   : > { %1340 = vmatprep.subr.bf16.mxu1 %v1988_v39 }
  0x69   : > { %1368 = vmatpush1.bf16.msra.mxu0 %v1941_v8 }
  0x6a   : > { %1369 = vmatprep.subr.bf16.mxu0 %v1949_v11 }
  0x6b   : > { %1341 = vmatpush2.bf16.msra.mxu1 %v1986_v40 }
  0x6c   : > { %1342 = vmatprep.subr.bf16.mxu1 %v1994_v43  ;;  %v1686_v43 = vld [vmem:[%s2296_s8 + $0x1] ss:$0 sm:$0xff] }
  0x6d   : > { %1370 = vmatpush1.bf16.msra.mxu0 %v1947_v12 }
  0x6e   : > { %1371 = vmatprep.subr.bf16.mxu0 %v1955_v15 }
  0x6f   : > { %1343 = vmatpush2.bf16.msra.mxu1 %v1992_v44 }
  0x70   : > { %1344 = vmatprep.subr.bf16.mxu1 %v2000_v47 }
  0x71   : > { %1372 = vmatpush1.bf16.msra.mxu0 %v1953_v16 }
  0x72   : > { %1373 = vmatprep.subr.bf16.mxu0 %v1961_v19 }
  0x73   : > { %1345 = vmatpush2.bf16.msra.mxu1 %v1998_v48 }
  0x74   : > { %1346 = vmatprep.subr.bf16.mxu1 %v2006_v52 }
  0x75   : > { %1374 = vmatpush1.bf16.msra.mxu0 %v1959_v20 }
  0x76   : > { %1375 = vmatprep.subr.bf16.mxu0 %v1967_v23 }
  0x77   : > { %1347 = vmatpush2.bf16.msra.mxu1 %v2004_v51 }
  0x78   : > { %1348 = vmatprep.subr.bf16.mxu1 %v2012_v55  ;;  %v2016_v55 = vld [vmem:[#allocation3 + $0x270] ss:$8 sps:$4 sm:$0xff]  }
  0x79   : > { %1376 = vmatpush1.bf16.msra.mxu0 %v1965_v24 }
  0x7a   : > { %1377 = vmatprep.subr.bf16.mxu0 %v1973_v27 }
  0x7b   : > { %1349 = vmatpush2.bf16.msra.mxu1 %v2010_v57 }
  0x7c   : > { %1404 = vmatprep.subr.bf16.mxu1 %v2018_v59 }
  0x7d   : > { %1378 = vmatpush2.bf16.msra.mxu0 %v1971_v28 }
  0x7e   : > { %1379 = vmatprep.subr.bf16.mxu0 %v1979_v31 }
  0x81   : > { %1380 = vmatpush2.bf16.msra.mxu0 %v1977_v34 }
  0x82   : > { %1381 = vmatprep.subr.bf16.mxu0 %v1985_v37 }
  0x85   : > { %1382 = vmatpush2.bf16.msra.mxu0 %v1983_v38 }
  0x86   : > { %1383 = vmatprep.subr.bf16.mxu0 %v1991_v41 }
  0x89   : > { %1384 = vmatpush2.bf16.msra.mxu0 %v1989_v42 }
  0x8a   : > { %1385 = vmatprep.subr.bf16.mxu0 %v1997_v45 }
  0x8d   : > { %1386 = vmatpush2.bf16.msra.mxu0 %v1995_v46  ;;  %v1687_v46 = vld [vmem:[%s2296_s8] ss:$0 sm:$0xff] }
  0x8e   : > { %1387 = vmatprep.subr.bf16.mxu0 %v2003_v49 }
  0x91   : > { %1388 = vmatpush2.bf16.msra.mxu0 %v2001_v50 }
  0x92   : > { %1389 = vmatprep.subr.bf16.mxu0 %v2009_v54 }
  0x95   : > { %1390 = vmatpush2.bf16.msra.mxu0 %v2007_v53 }
  0x96   : > { %1391 = vmatprep.subr.bf16.mxu0 %v2015_v56 }
  0x99   : > { %1392 = vmatpush2.bf16.msra.mxu0 %v2013_v58 }
  0xfc   : > { %v1798_v60 = vpop.f32.mrf.mxu0 }
  0xfe   : > { %v1799_v61 = vpop.f32.mrf.mxu0  ;;  %v1820_v62 = vpop.f32.mrf.mxu1 }
  0xff   : > { %v1800_v3 = vadd.f32 %v1799_v61, %v1798_v60 }
 0x100   : > { %v1801_v63 = vpop.f32.mrf.mxu0  ;;  %v1821_v0 = vpop.f32.mrf.mxu1 }
 0x101   : > { %v672_v7 = vadd.f32 %v1800_v3, %v1645_v5  ;;  %v1822_v8 = vadd.f32 %v1821_v0, %v1820_v62  ;;  %v2019_v3 = vld [vmem:[#allocation3 + $0x260] ss:$8 sps:$4 sm:$0xff]  }
 0x102   : > { %v1802_v1 = vpop.f32.mrf.mxu0  ;;  %v1823_v2 = vpop.f32.mrf.mxu1 }
 0x103   : > { %v1803_v4 = vadd.f32 %v1802_v1, %v1801_v63  ;;  %v713_v13 = vadd.f32 %v1822_v8, %v672_v7  ;;  %v2021_v1 = vld [vmem:[#allocation3 + $0x264] ss:$8 sps:$4 sm:$0xff]   ;;  %v2025_v8 = vld [vmem:[#allocation3 + $0x240] ss:$8 sps:$4 sm:$0xff]  }
 0x104   : > { %v1824_v6 = vpop.f32.mrf.mxu1  ;;  %v2027_v7 = vld [vmem:[#allocation3 + $0x244] ss:$8 sps:$4 sm:$0xff]  }
 0x105   : > { %v675_v9 = vadd.f32 %v1803_v4, %v1645_v5  ;;  %v1825_v10 = vadd.f32 %v1824_v6, %v1823_v2  ;;  %v2024_v4 = vld [vmem:[#allocation3 + $0x254] ss:$8 sps:$4 sm:$0xff]   ;;  %v2087_v5 = vmov 0   ;;  %v2022_v6 = vld [vmem:[#allocation3 + $0x250] ss:$8 sps:$4 sm:$0xff]  }
 0x107   : > { %v716_v14 = vadd.f32 %v1825_v10, %v675_v9  ;;  %v2030_v9 = vld [vmem:[#allocation3 + $0x234] ss:$8 sps:$4 sm:$0xff]   ;;  %v2028_v10 = vld [vmem:[#allocation3 + $0x230] ss:$8 sps:$4 sm:$0xff]  }
 0x11c   : > { %v753_v11 = vpop.f32.mrf.mxu0 }
 0x11d   : > { %v754_v16 = vadd.f32 %v753_v11, %v713_v13  ;;  %v2033_v11 = vld [vmem:[#allocation3 + $0x224] ss:$8 sps:$4 sm:$0xff]   ;;  %v2036_v13 = vld [vmem:[#allocation3 + $0x214] ss:$8 sps:$4 sm:$0xff]  }
 0x11e   : > { %v1853_v12 = vpop.f32.mrf.mxu0 }
 0x11f   : > { %v2031_v12 = vld [vmem:[#allocation3 + $0x220] ss:$8 sps:$4 sm:$0xff]  }
 0x120   : > { %v756_v15 = vpop.f32.mrf.mxu0 }
 0x121   : > { %v757_v17 = vadd.f32 %v756_v15, %v716_v14  ;;  %v2034_v14 = vld [vmem:[#allocation3 + $0x210] ss:$8 sps:$4 sm:$0xff]   ;;  %v2039_v15 = vld [vmem:[#allocation3 + $0x204] ss:$8 sps:$4 sm:$0xff]  }
 0x122   : > { %v1854_v18 = vpop.f32.mrf.mxu0 }
 0x123   : > { %v762_v19 = vadd.f32 %v757_v17, %v754_v16 }
 0x125   : > { %v763_v20 = vrot.slane %v762_v19, 4 }
 0x127   : > { %v764_v21 = vadd.f32 %v763_v20, %v762_v19  ;;  %v908_v20 = vlaneseq }
 0x129   : > { %v765_v22 = vrot.slane %v764_v21, 2 }
 0x12b   : > { %v766_v23 = vadd.f32 %v765_v22, %v764_v21  ;;  %v909_v22 = vshrl.u32 %v908_v20, 7 }
 0x12d   : > { %v767_v24 = vrot.slane %v766_v23, 1 }
 0x12f   : > { %v768_v25 = vadd.f32 %v767_v24, %v766_v23  ;;  %v2300_v24 = vsub.s32 0, %v909_v22 }
 0x131   : > { %v770_v26 = vmul.f32 0.0625, %v768_v25  ;;  %v906_v25 = vld [vmem:[%s2325_s4] sm:$0x3] }
 0x133   : > { %v771_v27 = vsub.f32 %v754_v16, %v770_v26  ;;  %v772_v28 = vsub.f32 %v757_v17, %v770_v26  ;;  %v2037_v16 = vld [vmem:[#allocation3 + $0x200] ss:$8 sps:$4 sm:$0xff]  }
 0x135   : > { %v773_v29 = vmul.f32 %v771_v27, %v771_v27  ;;  %v774_v30 = vmul.f32 %v772_v28, %v772_v28 }
 0x137   : > { %v775_v31 = vadd.f32 %v774_v30, %v773_v29  ;;  %v911_v29 = vrot.slane %v906_v25, %v2300_v24 }
 0x139   : > { %v776_v34 = vrot.slane %v775_v31, 4 }
 0x13b   : > { %v777_v35 = vadd.f32 %v776_v34, %v775_v31 }
 0x13d   : > { %v778_v36 = vrot.slane %v777_v35, 2 }
 0x13f   : > { %v779_v37 = vadd.f32 %v778_v36, %v777_v35 }
 0x141   : > { %v780_v38 = vrot.slane %v779_v37, 1 }
 0x143   : > { %v781_v39 = vadd.f32 %v780_v38, %v779_v37 }
 0x145   : > { %v782_v40 = vmul.f32 0.0625, %v781_v39 }
 0x147   : > { %v783_v41 = vadd.f32 1e-05, %v782_v40 }
 0x149   : > { %2040 = vrsqrt.f32 %v783_v41 }
 0x156   : > { %v2041_v42 = vpop.eup %2040 }
 0x157   : > { %v785_v44 = vmul.f32 %v2041_v42, %v771_v27  ;;  %v786_v45 = vmul.f32 %v2041_v42, %v772_v28  ;;  %v914_v27 = vsub.s32 1, %v909_v22 }
 0x159   : > { %v791_v47 = vmul.f32 %v1686_v43, %v785_v44  ;;  %v792_v48 = vmul.f32 %v1686_v43, %v786_v45  ;;  %v915_v31 = vrot.slane %v906_v25, %v914_v27 }
 0x15b   : > { %v797_v49 = vadd.f32 %v1687_v46, %v791_v47  ;;  %v798_v50 = vadd.f32 %v1687_v46, %v792_v48 }
 0x15d   : > { %vm799_vm1 = vcmp.ge.f32.partialorder %v797_v49, 0.0  ;;  %vm800_vm2 = vcmp.ge.f32.partialorder %v798_v50, 0.0  ;;  %v801_v51 = vmul.f32 0.0, %v797_v49  ;;  %v802_v52 = vmul.f32 0.0, %v798_v50 }
 0x15f   : > { %v803_v53 = vsel %vm799_vm1, %v797_v49, %v801_v51  ;;  %v804_v54 = vsel %vm800_vm2, %v798_v50, %v802_v52 }
 0x160   : > { %807 = vst [vmem:[#allocation2 - $0x2] sm:$0x4] %v803_v53  ;;  %808 = vst [vmem:[#allocation2] sm:$0x2] %v803_v53  ;;  %v823_v2 = vpack.c.bf16 %v804_v54, %v803_v53 }
 0x161   : > { %809 = vst [vmem:[#allocation2 + $0xc] sm:$0x40] %v804_v54  ;;  %810 = vst [vmem:[#allocation2 + $0xe] sm:$0x20] %v804_v54 }
 0x162   : > { %805 = vst [vmem:[#allocation2 + $0x2] sm:$0xff] %v803_v53  ;;  %806 = vst [vmem:[#allocation2 + $0xa] sm:$0xff] %v804_v54 }
 0x169   : > { %v813_v56 = vld [vmem:[#allocation2 + $0x1] sm:$0xff]  ;;  %v814_v57 = vld [vmem:[#allocation2 + $0x9] sm:$0xff] }
 0x16a   : > { %v817_v58 = vld [vmem:[#allocation2 + $0x3] sm:$0xff]  ;;  %v822_v59 = vpack.c.bf16 %v814_v57, %v813_v56  ;;  %v818_v60 = vld [vmem:[#allocation2 + $0xb] sm:$0xff] }
 0x16b   : > { %v811_v61 = vld [vmem:[#allocation2] sm:$0xff]  ;;  %v812_v62 = vld [vmem:[#allocation2 + $0x8] sm:$0xff]  ;;  %v824_v63 = vpack.c.bf16 %v818_v60, %v817_v58 }
 0x16c   : > { %v821_v0 = vpack.c.bf16 %v812_v62, %v811_v61  ;;  %1350 = vmatprep.mubr.bf16.mxu1 %v822_v59  ;;  %v819_v17 = vld [vmem:[#allocation2 + $0x4] sm:$0xff]  ;;  %v820_v18 = vld [vmem:[#allocation2 + $0xc] sm:$0xff] }
 0x16d   : > { %1393 = vmatprep.mubr.bf16.mxu0 %v824_v63  ;;  %v825_v19 = vpack.c.bf16 %v820_v18, %v819_v17 }
 0x16e   : > { %1351 = vmatmul.mubr.bf16.vlgmr.msra.gmra.mxu1 %v821_v0  ;;  %1394 = vmatmul.mubr.bf16.vlgmr.msra.gmra.mxu0 %v823_v2 }
 0x16f   : > { %1405 = vmatpush1.bf16.msra.mxu1 %v2016_v55  ;;  %1436 = vmatprep.mubr.bf16.mxu1 %v2087_v5 }
 0x170   : > { %1406 = vmatprep.subr.bf16.mxu1 %v2021_v1 }
 0x173   : > { %1407 = vmatpush1.bf16.msra.mxu1 %v2019_v3 }
 0x174   : > { %1408 = vmatprep.subr.bf16.mxu1 %v2024_v4 }
 0x177   : > { %1409 = vmatpush1.bf16.msra.mxu1 %v2022_v6 }
 0x178   : > { %1410 = vmatprep.subr.bf16.mxu1 %v2027_v7 }
 0x17b   : > { %1411 = vmatpush1.bf16.msra.mxu1 %v2025_v8 }
 0x17c   : > { %1412 = vmatprep.subr.bf16.mxu1 %v2030_v9 }
 0x17f   : > { %1413 = vmatpush1.bf16.msra.mxu1 %v2028_v10 }
 0x180   : > { %1414 = vmatprep.subr.bf16.mxu1 %v2033_v11 }
 0x183   : > { %1415 = vmatpush1.bf16.msra.mxu1 %v2031_v12 }
 0x184   : > { %1416 = vmatprep.subr.bf16.mxu1 %v2036_v13 }
 0x187   : > { %1417 = vmatpush1.bf16.msra.mxu1 %v2034_v14 }
 0x188   : > { %1418 = vmatprep.subr.bf16.mxu1 %v2039_v15 }
 0x18b   : > { %1419 = vmatpush1.bf16.msra.mxu1 %v2037_v16 }
 0x18e   : > { %1437 = vmatmul.mubr.bf16.vlgmr.msra.gmra.mxu1 %v825_v19 }
 0x22e   : > { %v1352_v21 = vpop.f32.mrf.mxu1  ;;  %v1395_v26 = vpop.f32.mrf.mxu0 }
 0x22f   : > { %v1353_v35 = vadd.f32 %v1352_v21, %v911_v29 }
 0x230   : > { %v1354_v23 = vpop.f32.mrf.mxu1  ;;  %v1397_v30 = vpop.f32.mrf.mxu0 }
 0x231   : > { %v1355_v39 = vadd.f32 %v1354_v23, %v915_v31  ;;  %v1396_v42 = vadd.f32 %v1395_v26, %v1353_v35 }
 0x232   : > { %v1356_v28 = vpop.f32.mrf.mxu1  ;;  %v1399_v37 = vpop.f32.mrf.mxu0 }
 0x233   : > { %v1357_v36 = vadd.f32 %v1356_v28, %v911_v29  ;;  %v1398_v46 = vadd.f32 %v1397_v30, %v1355_v39 }
 0x234   : > { %v1358_v34 = vpop.f32.mrf.mxu1  ;;  %v1401_v44 = vpop.f32.mrf.mxu0 }
 0x235   : > { %v1359_v40 = vadd.f32 %v1358_v34, %v915_v31  ;;  %v1400_v43 = vadd.f32 %v1399_v37, %v1357_v36 }
 0x237   : > { %v1402_v47 = vadd.f32 %v1401_v44, %v1359_v40  ;;  %v1768_v40 = vld [vmem:[%s2296_s8 + $0x3] ss:$0 sm:$0xff] }
 0x24e   : > { %v1438_v38 = vpop.f32.mrf.mxu1 }
 0x24f   : > { %v1439_v48 = vadd.f32 %v1438_v38, %v1396_v42 }
 0x250   : > { %v1440_v41 = vpop.f32.mrf.mxu1 }
 0x251   : > { %v1441_v51 = vadd.f32 %v1440_v41, %v1398_v46 }
 0x252   : > { %v1442_v45 = vpop.f32.mrf.mxu1 }
 0x253   : > { %v1443_v49 = vadd.f32 %v1442_v45, %v1400_v43  ;;  %v1769_v45 = vld [vmem:[%s2296_s8 + $0x2] ss:$0 sm:$0xff] }
 0x254   : > { %v1444_v50 = vpop.f32.mrf.mxu1 }
 0x255   : > { %v1447_v52 = vadd.f32 %v1443_v49, %v1439_v48  ;;  %v1445_v53 = vadd.f32 %v1444_v50, %v1402_v47 }
 0x257   : > { %v1448_v54 = vrot.slane %v1447_v52, 4  ;;  %v1454_v55 = vadd.f32 %v1445_v53, %v1441_v51 }
 0x259   : > { %v1449_v56 = vadd.f32 %v1448_v54, %v1447_v52  ;;  %v1455_v57 = vrot.slane %v1454_v55, 4 }
 0x25b   : > { %v1450_v58 = vrot.slane %v1449_v56, 2  ;;  %v1456_v59 = vadd.f32 %v1455_v57, %v1454_v55 }
 0x25d   : > { %v1451_v60 = vadd.f32 %v1450_v58, %v1449_v56  ;;  %v1457_v61 = vrot.slane %v1456_v59, 2 }
 0x25f   : > { %v1452_v62 = vrot.slane %v1451_v60, 1  ;;  %v1458_v63 = vadd.f32 %v1457_v61, %v1456_v59 }
 0x261   : > { %v1453_v0 = vadd.f32 %v1452_v62, %v1451_v60  ;;  %v1459_v1 = vrot.slane %v1458_v63, 1 }
 0x263   : > { %v1460_v2 = vadd.f32 %v1459_v1, %v1458_v63  ;;  %v1461_v3 = vmul.f32 0.0625, %v1453_v0 }
 0x265   : > { %v1462_v4 = vmul.f32 0.0625, %v1460_v2 }
 0x267   : > { %v1463_v5 = vadd.f32 %v1462_v4, %v1461_v3 }
 0x269   : > { %v1465_v6 = vmul.f32 0.5, %v1463_v5 }
 0x26b   : > { %v1469_v7 = vrot.slane %v1465_v6, %v2300_v24 }
 0x26d   : > { %v1470_v8 = vsub.f32 %v1439_v48, %v1469_v7  ;;  %v1471_v9 = vsub.f32 %v1441_v51, %v1469_v7  ;;  %v1472_v10 = vsub.f32 %v1443_v49, %v1469_v7  ;;  %v1473_v11 = vsub.f32 %v1445_v53, %v1469_v7 }
 0x26f   : > { %v1474_v12 = vmul.f32 %v1470_v8, %v1470_v8  ;;  %v1475_v13 = vmul.f32 %v1471_v9, %v1471_v9  ;;  %v1476_v14 = vmul.f32 %v1472_v10, %v1472_v10  ;;  %v1477_v15 = vmul.f32 %v1473_v11, %v1473_v11 }
 0x271   : > { %v1478_v16 = vadd.f32 %v1476_v14, %v1474_v12  ;;  %v1485_v17 = vadd.f32 %v1477_v15, %v1475_v13 }
 0x273   : > { %v1479_v18 = vrot.slane %v1478_v16, 4  ;;  %v1486_v19 = vrot.slane %v1485_v17, 4 }
 0x275   : > { %v1480_v20 = vadd.f32 %v1479_v18, %v1478_v16  ;;  %v1487_v21 = vadd.f32 %v1486_v19, %v1485_v17 }
 0x277   : > { %v1481_v22 = vrot.slane %v1480_v20, 2  ;;  %v1488_v23 = vrot.slane %v1487_v21, 2 }
 0x279   : > { %v1482_v25 = vadd.f32 %v1481_v22, %v1480_v20  ;;  %v1489_v26 = vadd.f32 %v1488_v23, %v1487_v21 }
 0x27b   : > { %v1483_v27 = vrot.slane %v1482_v25, 1  ;;  %v1490_v28 = vrot.slane %v1489_v26, 1 }
 0x27d   : > { %v1484_v29 = vadd.f32 %v1483_v27, %v1482_v25  ;;  %v1491_v30 = vadd.f32 %v1490_v28, %v1489_v26 }
 0x27f   : > { %v1492_v31 = vmul.f32 0.0625, %v1484_v29  ;;  %v1493_v34 = vmul.f32 0.0625, %v1491_v30 }
 0x281   : > { %v1494_v35 = vadd.f32 %v1493_v34, %v1492_v31 }
 0x283   : > { %v1495_v36 = vmul.f32 0.5, %v1494_v35 }
 0x285   : > { %v1496_v37 = vadd.f32 1e-05, %v1495_v36 }
 0x287   : > { %2042 = vrsqrt.f32 %v1496_v37 }
 0x294   : > { %v2043_v38 = vpop.eup %2042 }
 0x295   : > { %v1501_v39 = vrot.slane %v2043_v38, %v2300_v24 }
 0x297   : > { %v1502_v41 = vmul.f32 %v1501_v39, %v1470_v8  ;;  %v1503_v42 = vmul.f32 %v1501_v39, %v1471_v9  ;;  %v1504_v43 = vmul.f32 %v1501_v39, %v1472_v10  ;;  %v1505_v44 = vmul.f32 %v1501_v39, %v1473_v11 }
 0x299   : > { %v1512_v46 = vmul.f32 %v1768_v40, %v1502_v41  ;;  %v1513_v47 = vmul.f32 %v1768_v40, %v1503_v42  ;;  %v1514_v48 = vmul.f32 %v1768_v40, %v1504_v43  ;;  %v1515_v49 = vmul.f32 %v1768_v40, %v1505_v44 }
 0x29b   : > { %v1520_v50 = vadd.f32 %v1769_v45, %v1512_v46  ;;  %v1521_v51 = vadd.f32 %v1769_v45, %v1513_v47  ;;  %v1522_v52 = vadd.f32 %v1769_v45, %v1514_v48  ;;  %v1523_v53 = vadd.f32 %v1769_v45, %v1515_v49 }
 0x29d   : > { %vm1524_vm3 = vcmp.ge.f32.partialorder %v1520_v50, 0.0  ;;  %vm1525_vm4 = vcmp.ge.f32.partialorder %v1521_v51, 0.0  ;;  %vm1526_vm5 = vcmp.ge.f32.partialorder %v1522_v52, 0.0  ;;  %vm1527_vm6 = vcmp.ge.f32.partialorder %v1523_v53, 0.0 }
 0x29e   : > { %v1528_v24 = vmul.f32 0.0, %v1520_v50  ;;  %v1529_v54 = vmul.f32 0.0, %v1521_v51  ;;  %v1530_v55 = vmul.f32 0.0, %v1522_v52  ;;  %v1531_v56 = vmul.f32 0.0, %v1523_v53 }
 0x2a0   : > { %v1532_v57 = vsel %vm1524_vm3, %v1520_v50, %v1528_v24  ;;  %v1533_v58 = vsel %vm1525_vm4, %v1521_v51, %v1529_v54  ;;  %v1534_v59 = vsel %vm1526_vm5, %v1522_v52, %v1530_v55  ;;  %v1535_v60 = vsel %vm1527_vm6, %v1523_v53, %v1531_v56 }
 0x2a1   : > { %v1536_v61 = vadd.f32 %v2252_v32, %v1532_v57  ;;  %v1537_v62 = vadd.f32 %v2252_v32, %v1533_v58  ;;  %v1538_v63 = vadd.f32 %v2254_v33, %v1534_v59  ;;  %v1539_v0 = vadd.f32 %v2254_v33, %v1535_v60 }
 0x2a3   : > { %v1776_v1 = vpack.c.bf16 %v1537_v62, %v1536_v61  ;;  %v1777_v2 = vpack.c.bf16 %v1539_v0, %v1538_v63 }
 0x2a5   : > { %1552 = vst [vmem:[%s283_s14] sm:$0xff] %v1776_v1  ;;  %1553 = vst [vmem:[%s283_s14 + $0x8] sm:$0xff] %v1777_v2 }
 0x2a6 PF: > { %s17_s21 = sadd.s32 1, %s2080_s21  }
 0x2a7   : > { %p14_p1 = scmp.ge.s32.totalorder %s17_s21, 4  }
 0x2a9   :  { %16 = sbr.rel (!%p14_p1) target bundleno = 1 (0x1), region = 82 }
 0x2ae   :  { %1575 = vsyncpa [#allocation4], 1 }
 0x2af   :  { %1577 = vsyncpa [#allocation4 + $0x1], 1 }

</bundles_post_ra>
